<compile_context>
chip_gen: v6e
topology: v6e:2x2x1
jax: 0.10.0
libtpu: 0.0.40
codegen_flags: <defaults>
</compile_context>

<pallas_src>
import functools

import jax
import jax.numpy as jnp
from jax.experimental import pallas as pl
from jax.experimental.pallas import tpu as pltpu


# ----------------------------- Pallas kernel ------------------------------ #

def _guided_filter_kernel(x_ref, y_ref, out_ref, *, r, eps, shared_x, p):
    h, w = out_ref.shape[2], out_ref.shape[3]
    f32 = jnp.float32

    # ---- grid-invariant constants, generated on the fly (cheap vs. MXU) ----
    ih = jax.lax.broadcasted_iota(jnp.int32, (h, h), 0)
    jh = jax.lax.broadcasted_iota(jnp.int32, (h, h), 1)
    bh = (jnp.abs(ih - jh) <= r).astype(f32)               # (H, H) band matrix
    iw = jax.lax.broadcasted_iota(jnp.int32, (w, w), 0)
    jw = jax.lax.broadcasted_iota(jnp.int32, (w, w), 1)
    bw = (jnp.abs(iw - jw) <= r).astype(f32)               # (W, W) band matrix

    # 1/N where N = boxfilter(ones) = row_count (outer) col_count (separable).
    row_cnt = jnp.sum(bh, axis=1, keepdims=True)           # (H, 1)
    col_cnt = jnp.sum(bw, axis=0, keepdims=True)           # (1, W)
    inv_n = (jnp.broadcast_to(1.0 / row_cnt, (h, w)) *
             jnp.broadcast_to(1.0 / col_cnt, (h, w)))      # (H, W)

    def box_many(mats):
        # mats: list of (H, W) arrays -> list of box-filtered (H, W) arrays,
        # using ONE wide matmul per pass (lane-stack for B_H, sublane-stack
        # for B_W).
        k = len(mats)
        lane = jnp.concatenate(mats, axis=1)                          # (H, K*W)
        t = jnp.dot(bh, lane, preferred_element_type=f32)             # (H, K*W)
        sub = jnp.concatenate([t[:, i * w:(i + 1) * w] for i in range(k)],
                              axis=0)                                 # (K*H, W)
        u = jnp.dot(sub, bw, preferred_element_type=f32)              # (K*H, W)
        return [u[i * h:(i + 1) * h, :] for i in range(k)]

    # ---- load planes -------------------------------------------------------
    y_planes = [y_ref[0, q].astype(f32) for q in range(p)]
    if shared_x:
        x0 = x_ref[0, 0].astype(f32)
        x_planes = [x0] * p
    else:
        x_planes = [x_ref[0, q].astype(f32) for q in range(p)]

    # ---- phase 1: box(x), box(x*x), box(y), box(x*y) (fused matmuls) -------
    if shared_x:
        mats = [x_planes[0], x_planes[0] * x_planes[0]]
        mats += y_planes
        mats += [x_planes[q] * y_planes[q] for q in range(p)]
        boxed = box_many(mats)
        box_x = [boxed[0]] * p
        box_xx = [boxed[1]] * p
        off = 2
    else:
        mats = list(x_planes)
        mats += [xq * xq for xq in x_planes]
        mats += y_planes
        mats += [x_planes[q] * y_planes[q] for q in range(p)]
        boxed = box_many(mats)
        box_x = boxed[0:p]
        box_xx = boxed[p:2 * p]
        off = 2 * p
    box_y = boxed[off:off + p]
    box_xy = boxed[off + p:off + 2 * p]

    # ---- per-plane statistics (VPU; multiplies instead of divides) ---------
    a_planes, b_planes = [], []
    for q in range(p):
        mean_x = box_x[q] * inv_n
        mean_y = box_y[q] * inv_n
        cov_xy = box_xy[q] * inv_n - mean_x * mean_y
        var_x = box_xx[q] * inv_n - mean_x * mean_x
        a_q = cov_xy / (var_x + eps)        # the one data-dependent divide
        b_q = mean_y - a_q * mean_x
        a_planes.append(a_q)
        b_planes.append(b_q)

    # ---- phase 2: box(A), box(b) (fused matmuls) ----------------------------
    boxed2 = box_many(a_planes + b_planes)
    for q in range(p):
        mean_a = boxed2[q] * inv_n
        mean_b = boxed2[p + q] * inv_n
        out_ref[0, q] = (mean_a * x_planes[q] + mean_b).astype(out_ref.dtype)


# ------------------------------- JAX glue ---------------------------------- #

def _pick_plane_tile(c, h, w, n_batch):
    """Largest divisor of c keeping the per-step f32 working set modest."""
    budget = 24 * 1024 * 1024                 # bytes of temporaries per step
    fixed = 4 * (h * h + w * w + 4 * h * w)   # band matrices + constants
    per_plane = 4 * h * w * 28                # ~28 live (H, W) f32 per plane
    avail = max(budget - fixed, per_plane)
    max_p = max(1, avail // per_plane)
    if n_batch == 1 and c >= 2:
        # keep >= 2 grid slices so both v7x TensorCores get work
        max_p = min(max_p, max(1, c // 2))
    best = 1
    for d in range(1, c + 1):
        if c % d == 0 and d <= max_p:
            best = d
    return best


def guided_filter(x, y, r, eps=1e-8, plane_tile=None):
    """Pallas implementation of GuidedFilter(r, eps).forward(x, y). NCHW."""
    n_x, c_x, h, w = x.shape
    n_y, c_y, h_y, w_y = y.shape
    assert n_x == n_y
    assert c_x == 1 or c_x == c_y
    assert h == h_y and w == w_y
    assert h > 2 * r + 1 and w > 2 * r + 1

    shared_x = (c_x == 1) and (c_y > 1)
    xf = x.astype(jnp.float32)
    yf = y.astype(jnp.float32)

    p = plane_tile if plane_tile is not None else _pick_plane_tile(c_y, h, w, n_x)
    assert c_y % p == 0

    if shared_x:
        # No HBM broadcast of x: every channel tile re-reads the single plane.
        x_spec = pl.BlockSpec((1, 1, h, w), lambda n, c: (n, 0, 0, 0))
    else:
        x_spec = pl.BlockSpec((1, p, h, w), lambda n, c: (n, c, 0, 0))
    y_spec = pl.BlockSpec((1, p, h, w), lambda n, c: (n, c, 0, 0))
    out_spec = pl.BlockSpec((1, p, h, w), lambda n, c: (n, c, 0, 0))

    out = pl.pallas_call(
        functools.partial(_guided_filter_kernel, r=int(r), eps=float(eps),
                          shared_x=shared_x, p=int(p)),
        out_shape=jax.ShapeDtypeStruct((n_x, c_y, h, w), jnp.float32),
        grid_spec=pltpu.PrefetchScalarGridSpec(
            num_scalar_prefetch=0,
            grid=(n_x, c_y // p),
            in_specs=[x_spec, y_spec],
            out_specs=out_spec,
        ),
        compiler_params=pltpu.CompilerParams(
            dimension_semantics=("parallel", "parallel"),
            vmem_limit_bytes=48 * 1024 * 1024,
        ),
    )(xf, yf)
    return out


# ------------------- Pure-JAX reference (cumsum + diff) --------------------- #

def _diff_x(inp, r):
    left = inp[:, :, r:2 * r + 1]
    middle = inp[:, :, 2 * r + 1:] - inp[:, :, :-2 * r - 1]
    right = inp[:, :, -1:] - inp[:, :, -2 * r - 1:-r - 1]
    return jnp.concatenate([left, middle, right], axis=2)


def _diff_y(inp, r):
    left = inp[:, :, :, r:2 * r + 1]
    middle = inp[:, :, :, 2 * r + 1:] - inp[:, :, :, :-2 * r - 1]
    right = inp[:, :, :, -1:] - inp[:, :, :, -2 * r - 1:-r - 1]
    return jnp.concatenate([left, middle, right], axis=3)


def _boxfilter_ref(x, r):
    return _diff_y(_diff_x(jnp.cumsum(x, axis=2), r).cumsum(axis=3), r)


def _guided_filter_ref(x, y, r, eps=1e-8):
    n_x, c_x, h, w = x.shape
    N = _boxfilter_ref(jnp.ones((1, 1, h, w), jnp.float32), r)
    mean_x = _boxfilter_ref(x, r) / N
    mean_y = _boxfilter_ref(y, r) / N
    cov_xy = _boxfilter_ref(x * y, r) / N - mean_x * mean_y
    var_x = _boxfilter_ref(x * x, r) / N - mean_x * mean_x
    A = cov_xy / (var_x + eps)
    b = mean_y - A * mean_x
    mean_A = _boxfilter_ref(A, r) / N
    mean_b = _boxfilter_ref(b, r) / N
    return mean_A * x + mean_b


# --------------------------------- main ------------------------------------- #

if __name__ == "__main__":
    r = 2
    eps = 1e-8
    key = jax.random.PRNGKey(0)
    kx, ky, kx1 = jax.random.split(key, 3)

    # Case 1: per-channel guidance (c_x == c_y).
    x = jax.random.normal(kx, (2, 4, 16, 16), dtype=jnp.float32)
    y = jax.random.normal(ky, (2, 4, 16, 16), dtype=jnp.float32)
    out = jax.block_until_ready(guided_filter(x, y, r, eps))
    ref = _guided_filter_ref(x, y, r, eps)
    assert out.shape == ref.shape == (2, 4, 16, 16)
    assert jnp.allclose(out, ref, rtol=1e-4, atol=1e-4), "mismatch (c_x == c_y)"

    # Case 2: shared single-channel guidance (c_x == 1), no HBM broadcast of x.
    x1 = jax.random.normal(kx1, (2, 1, 16, 16), dtype=jnp.float32)
    out1 = jax.block_until_ready(guided_filter(x1, y, r, eps))
    ref1 = _guided_filter_ref(jnp.broadcast_to(x1, y.shape), y, r, eps)
    assert out1.shape == (2, 4, 16, 16)
    assert jnp.allclose(out1, ref1, rtol=1e-4, atol=1e-4), "mismatch (c_x == 1)"

    print("KERNEL_OK")
</pallas_src>

<mosaic_0001>
module attributes {stable_mosaic.version = 11 : i64} {
  func.func @_guided_filter_kernel(%arg0: i32, %arg1: i32, %arg2: memref<1x4x16x16xf32, #tpu.memory_space<vmem>>, %arg3: memref<1x4x16x16xf32, #tpu.memory_space<vmem>>, %arg4: memref<1x4x16x16xf32, #tpu.memory_space<vmem>>) attributes {dimension_semantics = [#tpu.dimension_semantics<parallel>, #tpu.dimension_semantics<parallel>], iteration_bounds = array<i64: 2, 1>, scalar_prefetch = 0 : i64, scratch_operands = 0 : i64, tpu.core_type = #tpu.core_type<tc>, window_params = [{transform_indices = @transform_0, window_bounds = array<i64: 1, 4, 16, 16>}, {transform_indices = @transform_1, window_bounds = array<i64: 1, 4, 16, 16>}, {transform_indices = @transform_2, window_bounds = array<i64: 1, 4, 16, 16>}]} {
    %0 = tpu.iota {dimensions = array<i32: 0>} : vector<16x16xi32>
    %1 = tpu.iota {dimensions = array<i32: 1>} : vector<16x16xi32>
    %2 = arith.subi %0, %1 : vector<16x16xi32>
    %3 = math.absi %2 : vector<16x16xi32>
    %c2_i32 = arith.constant 2 : i32
    %4 = vector.broadcast %c2_i32 : i32 to vector<16x16xi32>
    %5 = arith.cmpi sle, %3, %4 : vector<16x16xi32>
    %6 = arith.extui %5 : vector<16x16xi1> to vector<16x16xi32>
    %7 = arith.sitofp %6 : vector<16x16xi32> to vector<16x16xf32>
    %8 = tpu.iota {dimensions = array<i32: 0>} : vector<16x16xi32>
    %9 = tpu.iota {dimensions = array<i32: 1>} : vector<16x16xi32>
    %10 = arith.subi %8, %9 : vector<16x16xi32>
    %11 = math.absi %10 : vector<16x16xi32>
    %c2_i32_0 = arith.constant 2 : i32
    %12 = vector.broadcast %c2_i32_0 : i32 to vector<16x16xi32>
    %13 = arith.cmpi sle, %11, %12 : vector<16x16xi32>
    %14 = arith.extui %13 : vector<16x16xi1> to vector<16x16xi32>
    %15 = arith.sitofp %14 : vector<16x16xi32> to vector<16x16xf32>
    %cst = arith.constant dense<0.000000e+00> : vector<16xf32>
    %16 = vector.multi_reduction <add>, %7, %cst [1] : vector<16x16xf32> to vector<16xf32>
    %17 = vector.shape_cast %16 : vector<16xf32> to vector<16x1xf32>
    %cst_1 = arith.constant dense<0.000000e+00> : vector<16xf32>
    %18 = vector.multi_reduction <add>, %15, %cst_1 [0] : vector<16x16xf32> to vector<16xf32>
    %19 = vector.shape_cast %18 : vector<16xf32> to vector<1x16xf32>
    %cst_2 = arith.constant 1.000000e+00 : f32
    %20 = vector.broadcast %cst_2 : f32 to vector<16x1xf32>
    %21 = arith.divf %20, %17 : vector<16x1xf32>
    %22 = vector.shape_cast %21 : vector<16x1xf32> to vector<16x1xf32>
    %23 = vector.broadcast %22 : vector<16x1xf32> to vector<16x16xf32>
    %cst_3 = arith.constant 1.000000e+00 : f32
    %24 = vector.broadcast %cst_3 : f32 to vector<1x16xf32>
    %25 = arith.divf %24, %19 : vector<1x16xf32>
    %26 = vector.shape_cast %25 : vector<1x16xf32> to vector<1x16xf32>
    %27 = vector.broadcast %26 : vector<1x16xf32> to vector<16x16xf32>
    %28 = arith.mulf %23, %27 : vector<16x16xf32>
    %c0 = arith.constant 0 : index
    %c0_4 = arith.constant 0 : index
    %c0_5 = arith.constant 0 : index
    %c0_6 = arith.constant 0 : index
    %29 = vector.load %arg3[%c0, %c0_4, %c0_5, %c0_6] : memref<1x4x16x16xf32, #tpu.memory_space<vmem>>, vector<1x1x16x16xf32>
    %30 = vector.shape_cast %29 : vector<1x1x16x16xf32> to vector<16x16xf32>
    %c0_7 = arith.constant 0 : index
    %c1 = arith.constant 1 : index
    %c0_8 = arith.constant 0 : index
    %c0_9 = arith.constant 0 : index
    %31 = vector.load %arg3[%c0_7, %c1, %c0_8, %c0_9] : memref<1x4x16x16xf32, #tpu.memory_space<vmem>>, vector<1x1x16x16xf32>
    %32 = vector.shape_cast %31 : vector<1x1x16x16xf32> to vector<16x16xf32>
    %c0_10 = arith.constant 0 : index
    %c2 = arith.constant 2 : index
    %c0_11 = arith.constant 0 : index
    %c0_12 = arith.constant 0 : index
    %33 = vector.load %arg3[%c0_10, %c2, %c0_11, %c0_12] : memref<1x4x16x16xf32, #tpu.memory_space<vmem>>, vector<1x1x16x16xf32>
    %34 = vector.shape_cast %33 : vector<1x1x16x16xf32> to vector<16x16xf32>
    %c0_13 = arith.constant 0 : index
    %c3 = arith.constant 3 : index
    %c0_14 = arith.constant 0 : index
    %c0_15 = arith.constant 0 : index
    %35 = vector.load %arg3[%c0_13, %c3, %c0_14, %c0_15] : memref<1x4x16x16xf32, #tpu.memory_space<vmem>>, vector<1x1x16x16xf32>
    %36 = vector.shape_cast %35 : vector<1x1x16x16xf32> to vector<16x16xf32>
    %c0_16 = arith.constant 0 : index
    %c0_17 = arith.constant 0 : index
    %c0_18 = arith.constant 0 : index
    %c0_19 = arith.constant 0 : index
    %37 = vector.load %arg2[%c0_16, %c0_17, %c0_18, %c0_19] : memref<1x4x16x16xf32, #tpu.memory_space<vmem>>, vector<1x1x16x16xf32>
    %38 = vector.shape_cast %37 : vector<1x1x16x16xf32> to vector<16x16xf32>
    %c0_20 = arith.constant 0 : index
    %c1_21 = arith.constant 1 : index
    %c0_22 = arith.constant 0 : index
    %c0_23 = arith.constant 0 : index
    %39 = vector.load %arg2[%c0_20, %c1_21, %c0_22, %c0_23] : memref<1x4x16x16xf32, #tpu.memory_space<vmem>>, vector<1x1x16x16xf32>
    %40 = vector.shape_cast %39 : vector<1x1x16x16xf32> to vector<16x16xf32>
    %c0_24 = arith.constant 0 : index
    %c2_25 = arith.constant 2 : index
    %c0_26 = arith.constant 0 : index
    %c0_27 = arith.constant 0 : index
    %41 = vector.load %arg2[%c0_24, %c2_25, %c0_26, %c0_27] : memref<1x4x16x16xf32, #tpu.memory_space<vmem>>, vector<1x1x16x16xf32>
    %42 = vector.shape_cast %41 : vector<1x1x16x16xf32> to vector<16x16xf32>
    %c0_28 = arith.constant 0 : index
    %c3_29 = arith.constant 3 : index
    %c0_30 = arith.constant 0 : index
    %c0_31 = arith.constant 0 : index
    %43 = vector.load %arg2[%c0_28, %c3_29, %c0_30, %c0_31] : memref<1x4x16x16xf32, #tpu.memory_space<vmem>>, vector<1x1x16x16xf32>
    %44 = vector.shape_cast %43 : vector<1x1x16x16xf32> to vector<16x16xf32>
    %45 = arith.mulf %38, %38 : vector<16x16xf32>
    %46 = arith.mulf %40, %40 : vector<16x16xf32>
    %47 = arith.mulf %42, %42 : vector<16x16xf32>
    %48 = arith.mulf %44, %44 : vector<16x16xf32>
    %49 = arith.mulf %38, %30 : vector<16x16xf32>
    %50 = arith.mulf %40, %32 : vector<16x16xf32>
    %51 = arith.mulf %42, %34 : vector<16x16xf32>
    %52 = arith.mulf %44, %36 : vector<16x16xf32>
    %53 = tpu.concatenate %38, %40, %42, %44, %45, %46, %47, %48, %30, %32, %34, %36, %49, %50, %51, %52 in 1 : vector<16x16xf32>, vector<16x16xf32>, vector<16x16xf32>, vector<16x16xf32>, vector<16x16xf32>, vector<16x16xf32>, vector<16x16xf32>, vector<16x16xf32>, vector<16x16xf32>, vector<16x16xf32>, vector<16x16xf32>, vector<16x16xf32>, vector<16x16xf32>, vector<16x16xf32>, vector<16x16xf32>, vector<16x16xf32> -> vector<16x256xf32>
    %cst_32 = arith.constant dense<0.000000e+00> : vector<16x256xf32>
    %54 = tpu.matmul %7, %53, %cst_32 {dimension_numbers = #tpu.dot_dimension_numbers<[1], [0], [0], [1], [0, 0, 1, 1], [], []>} : vector<16x16xf32>, vector<16x256xf32>, vector<16x256xf32> -> vector<16x256xf32>
    %55 = vector.extract_strided_slice %54 {offsets = [0, 0], sizes = [16, 16], strides = [1, 1]} : vector<16x256xf32> to vector<16x16xf32>
    %56 = vector.extract_strided_slice %54 {offsets = [0, 16], sizes = [16, 16], strides = [1, 1]} : vector<16x256xf32> to vector<16x16xf32>
    %57 = vector.extract_strided_slice %54 {offsets = [0, 32], sizes = [16, 16], strides = [1, 1]} : vector<16x256xf32> to vector<16x16xf32>
    %58 = vector.extract_strided_slice %54 {offsets = [0, 48], sizes = [16, 16], strides = [1, 1]} : vector<16x256xf32> to vector<16x16xf32>
    %59 = vector.extract_strided_slice %54 {offsets = [0, 64], sizes = [16, 16], strides = [1, 1]} : vector<16x256xf32> to vector<16x16xf32>
    %60 = vector.extract_strided_slice %54 {offsets = [0, 80], sizes = [16, 16], strides = [1, 1]} : vector<16x256xf32> to vector<16x16xf32>
    %61 = vector.extract_strided_slice %54 {offsets = [0, 96], sizes = [16, 16], strides = [1, 1]} : vector<16x256xf32> to vector<16x16xf32>
    %62 = vector.extract_strided_slice %54 {offsets = [0, 112], sizes = [16, 16], strides = [1, 1]} : vector<16x256xf32> to vector<16x16xf32>
    %63 = vector.extract_strided_slice %54 {offsets = [0, 128], sizes = [16, 16], strides = [1, 1]} : vector<16x256xf32> to vector<16x16xf32>
    %64 = vector.extract_strided_slice %54 {offsets = [0, 144], sizes = [16, 16], strides = [1, 1]} : vector<16x256xf32> to vector<16x16xf32>
    %65 = vector.extract_strided_slice %54 {offsets = [0, 160], sizes = [16, 16], strides = [1, 1]} : vector<16x256xf32> to vector<16x16xf32>
    %66 = vector.extract_strided_slice %54 {offsets = [0, 176], sizes = [16, 16], strides = [1, 1]} : vector<16x256xf32> to vector<16x16xf32>
    %67 = vector.extract_strided_slice %54 {offsets = [0, 192], sizes = [16, 16], strides = [1, 1]} : vector<16x256xf32> to vector<16x16xf32>
    %68 = vector.extract_strided_slice %54 {offsets = [0, 208], sizes = [16, 16], strides = [1, 1]} : vector<16x256xf32> to vector<16x16xf32>
    %69 = vector.extract_strided_slice %54 {offsets = [0, 224], sizes = [16, 16], strides = [1, 1]} : vector<16x256xf32> to vector<16x16xf32>
    %70 = vector.extract_strided_slice %54 {offsets = [0, 240], sizes = [16, 16], strides = [1, 1]} : vector<16x256xf32> to vector<16x16xf32>
    %71 = tpu.concatenate %55, %56, %57, %58, %59, %60, %61, %62, %63, %64, %65, %66, %67, %68, %69, %70 in 0 : vector<16x16xf32>, vector<16x16xf32>, vector<16x16xf32>, vector<16x16xf32>, vector<16x16xf32>, vector<16x16xf32>, vector<16x16xf32>, vector<16x16xf32>, vector<16x16xf32>, vector<16x16xf32>, vector<16x16xf32>, vector<16x16xf32>, vector<16x16xf32>, vector<16x16xf32>, vector<16x16xf32>, vector<16x16xf32> -> vector<256x16xf32>
    %cst_33 = arith.constant dense<0.000000e+00> : vector<256x16xf32>
    %72 = tpu.matmul %71, %15, %cst_33 {dimension_numbers = #tpu.dot_dimension_numbers<[1], [0], [0], [1], [0, 0, 1, 1], [], []>} : vector<256x16xf32>, vector<16x16xf32>, vector<256x16xf32> -> vector<256x16xf32>
    %73 = vector.extract_strided_slice %72 {offsets = [0, 0], sizes = [16, 16], strides = [1, 1]} : vector<256x16xf32> to vector<16x16xf32>
    %74 = vector.extract_strided_slice %72 {offsets = [16, 0], sizes = [16, 16], strides = [1, 1]} : vector<256x16xf32> to vector<16x16xf32>
    %75 = vector.extract_strided_slice %72 {offsets = [32, 0], sizes = [16, 16], strides = [1, 1]} : vector<256x16xf32> to vector<16x16xf32>
    %76 = vector.extract_strided_slice %72 {offsets = [48, 0], sizes = [16, 16], strides = [1, 1]} : vector<256x16xf32> to vector<16x16xf32>
    %77 = vector.extract_strided_slice %72 {offsets = [64, 0], sizes = [16, 16], strides = [1, 1]} : vector<256x16xf32> to vector<16x16xf32>
    %78 = vector.extract_strided_slice %72 {offsets = [80, 0], sizes = [16, 16], strides = [1, 1]} : vector<256x16xf32> to vector<16x16xf32>
    %79 = vector.extract_strided_slice %72 {offsets = [96, 0], sizes = [16, 16], strides = [1, 1]} : vector<256x16xf32> to vector<16x16xf32>
    %80 = vector.extract_strided_slice %72 {offsets = [112, 0], sizes = [16, 16], strides = [1, 1]} : vector<256x16xf32> to vector<16x16xf32>
    %81 = vector.extract_strided_slice %72 {offsets = [128, 0], sizes = [16, 16], strides = [1, 1]} : vector<256x16xf32> to vector<16x16xf32>
    %82 = vector.extract_strided_slice %72 {offsets = [144, 0], sizes = [16, 16], strides = [1, 1]} : vector<256x16xf32> to vector<16x16xf32>
    %83 = vector.extract_strided_slice %72 {offsets = [160, 0], sizes = [16, 16], strides = [1, 1]} : vector<256x16xf32> to vector<16x16xf32>
    %84 = vector.extract_strided_slice %72 {offsets = [176, 0], sizes = [16, 16], strides = [1, 1]} : vector<256x16xf32> to vector<16x16xf32>
    %85 = vector.extract_strided_slice %72 {offsets = [192, 0], sizes = [16, 16], strides = [1, 1]} : vector<256x16xf32> to vector<16x16xf32>
    %86 = vector.extract_strided_slice %72 {offsets = [208, 0], sizes = [16, 16], strides = [1, 1]} : vector<256x16xf32> to vector<16x16xf32>
    %87 = vector.extract_strided_slice %72 {offsets = [224, 0], sizes = [16, 16], strides = [1, 1]} : vector<256x16xf32> to vector<16x16xf32>
    %88 = vector.extract_strided_slice %72 {offsets = [240, 0], sizes = [16, 16], strides = [1, 1]} : vector<256x16xf32> to vector<16x16xf32>
    %89 = arith.mulf %73, %28 : vector<16x16xf32>
    %90 = arith.mulf %81, %28 : vector<16x16xf32>
    %91 = arith.mulf %85, %28 : vector<16x16xf32>
    %92 = arith.mulf %89, %90 : vector<16x16xf32>
    %93 = arith.subf %91, %92 : vector<16x16xf32>
    %94 = arith.mulf %77, %28 : vector<16x16xf32>
    %95 = arith.mulf %89, %89 : vector<16x16xf32>
    %96 = arith.subf %94, %95 : vector<16x16xf32>
    %cst_34 = arith.constant 9.99999993E-9 : f32
    %97 = vector.broadcast %cst_34 : f32 to vector<16x16xf32>
    %98 = arith.addf %96, %97 : vector<16x16xf32>
    %99 = arith.divf %93, %98 : vector<16x16xf32>
    %100 = arith.mulf %99, %89 : vector<16x16xf32>
    %101 = arith.subf %90, %100 : vector<16x16xf32>
    %102 = arith.mulf %74, %28 : vector<16x16xf32>
    %103 = arith.mulf %82, %28 : vector<16x16xf32>
    %104 = arith.mulf %86, %28 : vector<16x16xf32>
    %105 = arith.mulf %102, %103 : vector<16x16xf32>
    %106 = arith.subf %104, %105 : vector<16x16xf32>
    %107 = arith.mulf %78, %28 : vector<16x16xf32>
    %108 = arith.mulf %102, %102 : vector<16x16xf32>
    %109 = arith.subf %107, %108 : vector<16x16xf32>
    %cst_35 = arith.constant 9.99999993E-9 : f32
    %110 = vector.broadcast %cst_35 : f32 to vector<16x16xf32>
    %111 = arith.addf %109, %110 : vector<16x16xf32>
    %112 = arith.divf %106, %111 : vector<16x16xf32>
    %113 = arith.mulf %112, %102 : vector<16x16xf32>
    %114 = arith.subf %103, %113 : vector<16x16xf32>
    %115 = arith.mulf %75, %28 : vector<16x16xf32>
    %116 = arith.mulf %83, %28 : vector<16x16xf32>
    %117 = arith.mulf %87, %28 : vector<16x16xf32>
    %118 = arith.mulf %115, %116 : vector<16x16xf32>
    %119 = arith.subf %117, %118 : vector<16x16xf32>
    %120 = arith.mulf %79, %28 : vector<16x16xf32>
    %121 = arith.mulf %115, %115 : vector<16x16xf32>
    %122 = arith.subf %120, %121 : vector<16x16xf32>
    %cst_36 = arith.constant 9.99999993E-9 : f32
    %123 = vector.broadcast %cst_36 : f32 to vector<16x16xf32>
    %124 = arith.addf %122, %123 : vector<16x16xf32>
    %125 = arith.divf %119, %124 : vector<16x16xf32>
    %126 = arith.mulf %125, %115 : vector<16x16xf32>
    %127 = arith.subf %116, %126 : vector<16x16xf32>
    %128 = arith.mulf %76, %28 : vector<16x16xf32>
    %129 = arith.mulf %84, %28 : vector<16x16xf32>
    %130 = arith.mulf %88, %28 : vector<16x16xf32>
    %131 = arith.mulf %128, %129 : vector<16x16xf32>
    %132 = arith.subf %130, %131 : vector<16x16xf32>
    %133 = arith.mulf %80, %28 : vector<16x16xf32>
    %134 = arith.mulf %128, %128 : vector<16x16xf32>
    %135 = arith.subf %133, %134 : vector<16x16xf32>
    %cst_37 = arith.constant 9.99999993E-9 : f32
    %136 = vector.broadcast %cst_37 : f32 to vector<16x16xf32>
    %137 = arith.addf %135, %136 : vector<16x16xf32>
    %138 = arith.divf %132, %137 : vector<16x16xf32>
    %139 = arith.mulf %138, %128 : vector<16x16xf32>
    %140 = arith.subf %129, %139 : vector<16x16xf32>
    %141 = tpu.concatenate %99, %112, %125, %138, %101, %114, %127, %140 in 1 : vector<16x16xf32>, vector<16x16xf32>, vector<16x16xf32>, vector<16x16xf32>, vector<16x16xf32>, vector<16x16xf32>, vector<16x16xf32>, vector<16x16xf32> -> vector<16x128xf32>
    %cst_38 = arith.constant dense<0.000000e+00> : vector<16x128xf32>
    %142 = tpu.matmul %7, %141, %cst_38 {dimension_numbers = #tpu.dot_dimension_numbers<[1], [0], [0], [1], [0, 0, 1, 1], [], []>} : vector<16x16xf32>, vector<16x128xf32>, vector<16x128xf32> -> vector<16x128xf32>
    %143 = vector.extract_strided_slice %142 {offsets = [0, 0], sizes = [16, 16], strides = [1, 1]} : vector<16x128xf32> to vector<16x16xf32>
    %144 = vector.extract_strided_slice %142 {offsets = [0, 16], sizes = [16, 16], strides = [1, 1]} : vector<16x128xf32> to vector<16x16xf32>
    %145 = vector.extract_strided_slice %142 {offsets = [0, 32], sizes = [16, 16], strides = [1, 1]} : vector<16x128xf32> to vector<16x16xf32>
    %146 = vector.extract_strided_slice %142 {offsets = [0, 48], sizes = [16, 16], strides = [1, 1]} : vector<16x128xf32> to vector<16x16xf32>
    %147 = vector.extract_strided_slice %142 {offsets = [0, 64], sizes = [16, 16], strides = [1, 1]} : vector<16x128xf32> to vector<16x16xf32>
    %148 = vector.extract_strided_slice %142 {offsets = [0, 80], sizes = [16, 16], strides = [1, 1]} : vector<16x128xf32> to vector<16x16xf32>
    %149 = vector.extract_strided_slice %142 {offsets = [0, 96], sizes = [16, 16], strides = [1, 1]} : vector<16x128xf32> to vector<16x16xf32>
    %150 = vector.extract_strided_slice %142 {offsets = [0, 112], sizes = [16, 16], strides = [1, 1]} : vector<16x128xf32> to vector<16x16xf32>
    %151 = tpu.concatenate %143, %144, %145, %146, %147, %148, %149, %150 in 0 : vector<16x16xf32>, vector<16x16xf32>, vector<16x16xf32>, vector<16x16xf32>, vector<16x16xf32>, vector<16x16xf32>, vector<16x16xf32>, vector<16x16xf32> -> vector<128x16xf32>
    %cst_39 = arith.constant dense<0.000000e+00> : vector<128x16xf32>
    %152 = tpu.matmul %151, %15, %cst_39 {dimension_numbers = #tpu.dot_dimension_numbers<[1], [0], [0], [1], [0, 0, 1, 1], [], []>} : vector<128x16xf32>, vector<16x16xf32>, vector<128x16xf32> -> vector<128x16xf32>
    %153 = vector.extract_strided_slice %152 {offsets = [0, 0], sizes = [16, 16], strides = [1, 1]} : vector<128x16xf32> to vector<16x16xf32>
    %154 = vector.extract_strided_slice %152 {offsets = [16, 0], sizes = [16, 16], strides = [1, 1]} : vector<128x16xf32> to vector<16x16xf32>
    %155 = vector.extract_strided_slice %152 {offsets = [32, 0], sizes = [16, 16], strides = [1, 1]} : vector<128x16xf32> to vector<16x16xf32>
    %156 = vector.extract_strided_slice %152 {offsets = [48, 0], sizes = [16, 16], strides = [1, 1]} : vector<128x16xf32> to vector<16x16xf32>
    %157 = vector.extract_strided_slice %152 {offsets = [64, 0], sizes = [16, 16], strides = [1, 1]} : vector<128x16xf32> to vector<16x16xf32>
    %158 = vector.extract_strided_slice %152 {offsets = [80, 0], sizes = [16, 16], strides = [1, 1]} : vector<128x16xf32> to vector<16x16xf32>
    %159 = vector.extract_strided_slice %152 {offsets = [96, 0], sizes = [16, 16], strides = [1, 1]} : vector<128x16xf32> to vector<16x16xf32>
    %160 = vector.extract_strided_slice %152 {offsets = [112, 0], sizes = [16, 16], strides = [1, 1]} : vector<128x16xf32> to vector<16x16xf32>
    %161 = arith.mulf %153, %28 : vector<16x16xf32>
    %162 = arith.mulf %157, %28 : vector<16x16xf32>
    %163 = arith.mulf %161, %38 : vector<16x16xf32>
    %164 = arith.addf %163, %162 : vector<16x16xf32>
    %c0_40 = arith.constant 0 : index
    %c0_41 = arith.constant 0 : index
    %c0_42 = arith.constant 0 : index
    %c0_43 = arith.constant 0 : index
    %165 = vector.load %arg4[%c0_40, %c0_41, %c0_42, %c0_43] : memref<1x4x16x16xf32, #tpu.memory_space<vmem>>, vector<1x1x16x16xf32>
    %166 = vector.shape_cast %165 : vector<1x1x16x16xf32> to vector<16x16xf32>
    %167 = vector.shape_cast %164 : vector<16x16xf32> to vector<1x1x16x16xf32>
    tpu.vector_store %arg4[%c0_40, %c0_41, %c0_42, %c0_43], %167 {strides = array<i32>} : memref<1x4x16x16xf32, #tpu.memory_space<vmem>>, vector<1x1x16x16xf32>,
    %168 = arith.mulf %154, %28 : vector<16x16xf32>
    %169 = arith.mulf %158, %28 : vector<16x16xf32>
    %170 = arith.mulf %168, %40 : vector<16x16xf32>
    %171 = arith.addf %170, %169 : vector<16x16xf32>
    %c0_44 = arith.constant 0 : index
    %c1_45 = arith.constant 1 : index
    %c0_46 = arith.constant 0 : index
    %c0_47 = arith.constant 0 : index
    %172 = vector.load %arg4[%c0_44, %c1_45, %c0_46, %c0_47] : memref<1x4x16x16xf32, #tpu.memory_space<vmem>>, vector<1x1x16x16xf32>
    %173 = vector.shape_cast %172 : vector<1x1x16x16xf32> to vector<16x16xf32>
    %174 = vector.shape_cast %171 : vector<16x16xf32> to vector<1x1x16x16xf32>
    tpu.vector_store %arg4[%c0_44, %c1_45, %c0_46, %c0_47], %174 {strides = array<i32>} : memref<1x4x16x16xf32, #tpu.memory_space<vmem>>, vector<1x1x16x16xf32>,
    %175 = arith.mulf %155, %28 : vector<16x16xf32>
    %176 = arith.mulf %159, %28 : vector<16x16xf32>
    %177 = arith.mulf %175, %42 : vector<16x16xf32>
    %178 = arith.addf %177, %176 : vector<16x16xf32>
    %c0_48 = arith.constant 0 : index
    %c2_49 = arith.constant 2 : index
    %c0_50 = arith.constant 0 : index
    %c0_51 = arith.constant 0 : index
    %179 = vector.load %arg4[%c0_48, %c2_49, %c0_50, %c0_51] : memref<1x4x16x16xf32, #tpu.memory_space<vmem>>, vector<1x1x16x16xf32>
    %180 = vector.shape_cast %179 : vector<1x1x16x16xf32> to vector<16x16xf32>
    %181 = vector.shape_cast %178 : vector<16x16xf32> to vector<1x1x16x16xf32>
    tpu.vector_store %arg4[%c0_48, %c2_49, %c0_50, %c0_51], %181 {strides = array<i32>} : memref<1x4x16x16xf32, #tpu.memory_space<vmem>>, vector<1x1x16x16xf32>,
    %182 = arith.mulf %156, %28 : vector<16x16xf32>
    %183 = arith.mulf %160, %28 : vector<16x16xf32>
    %184 = arith.mulf %182, %44 : vector<16x16xf32>
    %185 = arith.addf %184, %183 : vector<16x16xf32>
    %c0_52 = arith.constant 0 : index
    %c3_53 = arith.constant 3 : index
    %c0_54 = arith.constant 0 : index
    %c0_55 = arith.constant 0 : index
    %186 = vector.load %arg4[%c0_52, %c3_53, %c0_54, %c0_55] : memref<1x4x16x16xf32, #tpu.memory_space<vmem>>, vector<1x1x16x16xf32>
    %187 = vector.shape_cast %186 : vector<1x1x16x16xf32> to vector<16x16xf32>
    %188 = vector.shape_cast %185 : vector<16x16xf32> to vector<1x1x16x16xf32>
    tpu.vector_store %arg4[%c0_52, %c3_53, %c0_54, %c0_55], %188 {strides = array<i32>} : memref<1x4x16x16xf32, #tpu.memory_space<vmem>>, vector<1x1x16x16xf32>,
    return
  }
  func.func @transform_0(%arg0: i32, %arg1: i32) -> (i32, i32, i32, i32) {
    %c0_i32 = arith.constant 0 : i32
    %c0_i32_0 = arith.constant 0 : i32
    %c0_i32_1 = arith.constant 0 : i32
    return %arg0, %arg1, %c0_i32, %c0_i32_0 : i32, i32, i32, i32
  }
  func.func @transform_1(%arg0: i32, %arg1: i32) -> (i32, i32, i32, i32) {
    %c0_i32 = arith.constant 0 : i32
    %c0_i32_0 = arith.constant 0 : i32
    %c0_i32_1 = arith.constant 0 : i32
    return %arg0, %arg1, %c0_i32, %c0_i32_0 : i32, i32, i32, i32
  }
  func.func @transform_2(%arg0: i32, %arg1: i32) -> (i32, i32, i32, i32) {
    %c0_i32 = arith.constant 0 : i32
    %c0_i32_0 = arith.constant 0 : i32
    %c0_i32_1 = arith.constant 0 : i32
    return %arg0, %arg1, %c0_i32, %c0_i32_0 : i32, i32, i32, i32
  }
}

</mosaic_0001>

<bundles_post_ra>
// kernel: tpu_custom_call.1
= control target key start
LH: loop header
LB: loop body
LE: loop exit
PB: predicated region body
PF: predicated region fallthrough
CT: control target
= control target key end

     0   :  { %7 = vsyncpa [#allocation3], 0  ;;  %s2659_s0 = inlined_call_operand.hbm [shape: f32[2,4,16,16], index: 0, kind: input, shape index: {}]   ;;  %s2660_s1 = inlined_call_operand.hbm [shape: f32[2,4,16,16], index: 1, kind: input, shape index: {}]   ;;  %s2661_s2 = inlined_call_operand.hbm [shape: f32[2,4,16,16], index: 2, kind: output, shape index: {}]  }
   0x1   :  { %9 = vsyncpa [#allocation3 + $0x1], 0 }
   0x2   :  { %10 = vsyncpa [#allocation6], 0 }
   0x3   :  { %12 = vsyncpa [#allocation6 + $0x1], 0 }
   0x4   :  { %13 = vsyncpa [#allocation4], 0 }
   0x5   :  { %15 = vsyncpa [#allocation4 + $0x1], 0  ;;  %s2043_s9 = smov 0   ;;  %s2045_s10 = smov 0  }
   0x6   :  { %s2047_s11 = smov 0   ;;  %s2049_s12 = smov 0  }
   0x7   :  { %s2051_s13 = smov 0   ;;  %s2053_s14 = smov 0  }
   0x8 LB: > { %s1515_s15 = sadd.s32 4294967295, %s2010_s14   ;;  %s1516_s16 = sadd.s32 4294967294, %s2010_s14   ;;  %s2010_s14 = sphi %s2053_s14, %s21_s14   ;;  %s2006_s13 = sphi %s2051_s13, %s2672_s13   ;;  %s2002_s12 = sphi %s2049_s12, %s2671_s12   ;;  %s1998_s11 = sphi %s2047_s11, %s2670_s11   ;;  %s1994_s10 = sphi %s2045_s10, %s2669_s10   ;;  %s1990_s9 = sphi %s2043_s9, %s2668_s9  }
   0x9   : > { %s33_s17 = sadd.s32 1, %s2006_s13  ;;  %s42_s18 = sadd.s32 1, %s1998_s11 }
   0xa   : > { %p35_p0 = scmp.ge.s32.totalorder %s33_s17, 2  ;;  %p49_p1 = scmp.ne.s32.totalorder %s1998_s11, %s1994_s10 }
   0xb   : > { %p50_p2 = scmp.eq.s32.totalorder %s2010_s14, 0  ;;  %p55_p3 = scmp.ne.s32.totalorder %s1994_s10, %s1990_s9 }
   0xc   : > { %s2674_s17 = smov (%p35_p0, %s33_s17), 0  ;;  %p56_p5 = scmp.eq.s32.totalorder %s1515_s15, 0 }
   0xd   : > { %p2084_p4 = por %p50_p2, %p49_p1  ;;  %s37_s20 = ssub.s32 %s2006_s13, %s2674_s17 }
   0xe   : > { %p109_p6 = scmp.eq.s32.totalorder %s1515_s15, 1  ;;  %p40_p7 = scmp.eq.s32.totalorder %s37_s20, 0 }
   0xf   : > { %p2090_p8 = por %p56_p5, %p55_p3  ;;  %p115_p10 = scmp.eq.s32.totalorder %s1516_s16, 1 }
  0x10   : > { %p2094_p9 = por %p109_p6, %p49_p1  ;;  %p1518_p12 = scmp.ge.s32.totalorder %s2010_s14, 2 }
  0x11   : > { %s2099_s23 = scalar_select %p40_p7, %s1998_s11, %s42_s18  }
  0x12   : > { %p2101_p11 = por %p115_p10, %p55_p3  ;;  %p1779_p13 = scmp.lt.s32.totalorder %s2010_s14, 2 }
  0x13   : > { %s2108_s25 = sand.u32 1, %s1998_s11   ;;  %s1612_s27 = sshll.u32 %s2006_s13, 10 }
  0x14   : > { %s1519_s26 = sshll.u32 %s2108_s25, 6  ;;  %s148_s30 = scalar_lea.hbm %s2659_s0, %s1612_s27 }
  0x15   : > { %s139_s3 = scalar_lea.vmem [#allocation2], %s1519_s26  ;;  %p2121_p0 = pnand %p1779_p13, %p2084_p4 }
  0x16   : > { %s149_s4 = sshll.u32 %s139_s3, 4  ;;  %p1525_p1 = scmp.ge.s32.totalorder %s2010_s14, 1  ;;  %s150_s4 = int_to_ptr.vmem [resolvable:$true] %s149_s4 }
  0x17   : > { %s136_s6 = scalar_lea.sflag [#allocation3], %s2108_s25  ;;  %p1872_p2 = pneg %p2121_p0 }
  0x18   : > { %s1883_s7 = scalar_lea.vmem %s150_s4, 1024  ;;  %s2012_s8 = smov [#allocation2]  }
  0x19   : > { %p1884_p3 = scmp.ne.s32.totalorder %s150_s4, %s1883_s7  ;;  %s1888_s15 = sshll.u32 %s2012_s8, 4  ;;  %s1889_s15 = int_to_ptr.vmem [resolvable:$false] %s1888_s15 }
  0x1a   : > { %s1890_s16 = scalar_lea.vmem %s1889_s15, 2048  ;;  %p1891_p4 = scmp.lt.s32.totalorder %s150_s4, %s1889_s15 }
  0x1b   : > { %p1886_p5 = pnand %p1884_p3, %p1872_p2  ;;  %p1892_p7 = scmp.lt.s32.totalorder %s1890_s16, %s1883_s7 }
  0x1d   : > { %p1887_p6 = pneg %p1886_p5  ;;  %p1893_p10 = por %p1892_p7, %p1891_p4 }
  0x1f   : > { %p1894_p13 = pnand %p1893_p10, %p1887_p6 }
  0x21   : > { %1897 = shalt.err (!%p1894_p13)
}
  0x22   : > { %s2013_s18 = smov 128   ;;  %s2014_s19 = smov 8  }
  0x23   : > { %1771 = dma.hbm_to_vmem [thread:$0]  (!%p2121_p0), %s148_s30, 1024, %s150_s4, %s136_s6, %s2013_s18, %s2013_s18, %s2014_s19  }
  0x24   : > { %p181_p3 = scmp.lt.s32.totalorder %s2010_s14, 3  ;;  %s172_s29 = scalar_lea.hbm %s2660_s1, %s1612_s27 }
  0x25   : > { %s163_s7 = scalar_lea.vmem [#allocation5], %s1519_s26  ;;  %s160_s15 = scalar_lea.sflag [#allocation6], %s2108_s25 }
  0x26   : > { %p2142_p5 = pnand %p1525_p1, %p181_p3  ;;  %s173_s8 = sshll.u32 %s163_s7, 4  ;;  %s174_s8 = int_to_ptr.vmem [resolvable:$true] %s173_s8 }
  0x27   : > { %s1911_s16 = scalar_lea.vmem %s174_s8, 1024  ;;  %s2015_s30 = smov [#allocation5]  }
  0x28   : > { %p1912_p6 = scmp.ne.s32.totalorder %s174_s8, %s1911_s16  ;;  %s1916_s4 = sshll.u32 %s2015_s30, 4  ;;  %s1917_s4 = int_to_ptr.vmem [resolvable:$false] %s1916_s4 }
  0x29   : > { %s1918_s27 = scalar_lea.vmem %s1917_s4, 2048  ;;  %p1919_p10 = scmp.lt.s32.totalorder %s174_s8, %s1917_s4 }
  0x2a   : > { %p1914_p4 = pnand %p1912_p6, %p1872_p2  ;;  %p1920_p1 = scmp.lt.s32.totalorder %s1918_s27, %s1911_s16 }
  0x2c   : > { %p1915_p7 = pneg %p1914_p4  ;;  %p1921_p13 = por %p1920_p1, %p1919_p10 }
  0x2e   : > { %p1922_p3 = pnand %p1921_p13, %p1915_p7 }
  0x30   : > { %1925 = shalt.err (!%p1922_p3)
}
  0x31   : > { %1774 = dma.hbm_to_vmem [thread:$0]  (!%p2121_p0), %s172_s29, 1024, %s174_s8, %s160_s15, %s2013_s18, %s2013_s18, %s2014_s19  }
  0x32   : > { %185 = sbr.rel (%p2142_p5) target bundleno = 1477 (0x5c5), region = 28  ;;  %s2157_s25 = sand.u32 (!%p2142_p5), 1, %s1994_s10  }
  0x33   : > { %s2160_s26 = sshll.u32 (!%p2142_p5), %s2157_s25, 6  ;;  %s188_s6 = scalar_lea.sflag (!%p2142_p5), [#allocation3], %s2157_s25 }
  0x34   : > { %s2164_s20 = scalar_lea.vmem (!%p2142_p5), [#allocation2], %s2160_s26 }
  0x37   : > { %1977 = dma.done.wait (%p2090_p8), %s188_s6, 1024  }
  0x38   : > { %1979 = vsyncadd (%p2090_p8), %s188_s6, 4294966272  ;;  %s197_s5 = scalar_lea.sflag [#allocation6], %s2157_s25  ;;  %s2172_s18 = scalar_lea.vmem [#allocation5], %s2160_s26 }
  0x39   : > { %1981 = dma.done.wait (%p2090_p8), %s197_s5, 1024  }
  0x3a   : > { %1983 = vsyncadd (%p2090_p8), %s197_s5, 4294966272  ;;  %v1536_v0 = vld [vmem:[%s2172_s18 + $0x28] sm:$0xff]  ;;  %v1534_v1 = vld [vmem:[%s2172_s18 + $0x18] sm:$0xff]  ;;  %s2016_s19 = smov 32   ;;  %s2017_s28 = smov 16   ;;  %v2023_v28 = vmov 0.0   ;;  %v229_v49 = vlaneseq }
  0x3b   : > { %376 = vrot.lane.b32.xlu1 %v1536_v0, %s2016_s19  ;;  %368 = vrot.lane.b32.xlu0 %v1534_v1, %s2017_s28  ;;  %v1542_v2 = vld [vmem:[%s2164_s20 + $0x28] sm:$0xff]  ;;  %v1540_v3 = vld [vmem:[%s2164_s20 + $0x18] sm:$0xff]  ;;  %s2018_s21 = smov 48   ;;  %s2019_s29 = smov 64   ;;  %vm248_vm0 = vcmask 130048   ;;  %vm422_vm1 = vcmask 261120  }
  0x3c   : > { %v1538_v4 = vld [vmem:[%s2172_s18 + $0x38] sm:$0xff]  ;;  %v1533_v5 = vld [vmem:[%s2172_s18 + $0x10] sm:$0xff]  ;;  %v2193_v8 = vld [vmem:[%s2172_s18 + $0x8] sm:$0xff]  ;;  %v303_v14 = vmul.f32 %v1540_v3, %v1534_v1  ;;  %s2020_s3 = smov 80   ;;  %v295_v16 = vmul.f32 %v1540_v3, %v1540_v3  ;;  %v305_v20 = vmul.f32 %v1542_v2, %v1536_v0  ;;  %s2021_s7 = smov 96   ;;  %v297_v22 = vmul.f32 %v1542_v2, %v1542_v2  ;;  %524 = vmatprep.mubr.f32.mxu0 %v2023_v28 }
  0x3d   : > { %v1544_v6 = vld [vmem:[%s2164_s20 + $0x38] sm:$0xff]  ;;  %v1539_v7 = vld [vmem:[%s2164_s20 + $0x10] sm:$0xff]  ;;  %v2196_v9 = vld [vmem:[%s2164_s20 + $0x8] sm:$0xff]  ;;  %s2022_s8 = smov 112   ;;  %vm425_vm2 = vcmask 392192   ;;  %v230_v53 = vshrl.u32 %v229_v49, 7 }
  0x3e   : > { %v301_v10 = vmul.f32 %v2196_v9, %v2193_v8  ;;  %v1535_v11 = vld [vmem:[%s2172_s18 + $0x20] sm:$0xff]  ;;  %v293_v12 = vmul.f32 %v2196_v9, %v2196_v9  ;;  %v1537_v15 = vld [vmem:[%s2172_s18 + $0x30] sm:$0xff]  ;;  %v307_v24 = vmul.f32 %v1544_v6, %v1538_v4  ;;  %v302_v25 = vmul.f32 %v1539_v7, %v1533_v5  ;;  %s2572_s15 = scalar_lea.vmem [#allocation7], %s2160_s26  ;;  %s1614_s16 = sshll.u32 %s2002_s12, 10 }
  0x3f   : > { %320 = vrot.lane.b32.xlu1 %v1542_v2, %s2016_s19  ;;  %312 = vrot.lane.b32.xlu0 %v1540_v3, %s2017_s28  ;;  %v1541_v13 = vld [vmem:[%s2164_s20 + $0x20] sm:$0xff]  ;;  %v1543_v17 = vld [vmem:[%s2164_s20 + $0x30] sm:$0xff]  ;;  %v299_v26 = vmul.f32 %v1544_v6, %v1544_v6  ;;  %v294_v27 = vmul.f32 %v1539_v7, %v1539_v7  ;;  %v233_v54 = vand.u32 127, %v229_v49  ;;  %vm428_vm3 = vcmask 523264   ;;  %s1402_s30 = sshll.u32 %s2572_s15, 4  ;;  %s2605_s26 = scalar_lea.hbm %s2661_s2, %s1614_s16  ;;  %s2607_s30 = int_to_ptr.vmem [resolvable:$true] %s1402_s30 }
  0x40   : > { %v2215_v18 = vld [vmem:[%s2172_s18] sm:$0xff]  ;;  %v304_v29 = vmul.f32 %v1541_v13, %v1535_v11  ;;  %v296_v30 = vmul.f32 %v1541_v13, %v1541_v13  ;;  %v306_v31 = vmul.f32 %v1543_v17, %v1537_v15  ;;  %v298_v32 = vmul.f32 %v1543_v17, %v1543_v17  ;;  %s1386_s12 = scalar_lea.sflag [#allocation4], %s2157_s25  ;;  %s1926_s6 = scalar_lea.vmem %s2607_s30, 1024 }
  0x41   : > { %v2218_v19 = vld [vmem:[%s2164_s20] sm:$0xff]  ;;  %vm431_vm4 = vcmask 654336   ;;  %vm434_vm5 = vcmask 785408   ;;  %vm437_vm6 = vcmask 916480   ;;  %v234_v61 = vsub.s32 %v230_v53, %v233_v54  ;;  %p1927_p8 = scmp.ne.s32.totalorder %s2607_s30, %s1926_s6 }
  0x42   : > { %v300_v21 = vmul.f32 %v2218_v19, %v2215_v18  ;;  %v292_v23 = vmul.f32 %v2218_v19, %v2218_v19  ;;  %v231_v62 = vadd.s32 8, %v230_v53 }
  0x43   : > { %384 = vrot.lane.b32.xlu1 %v1538_v4, %s2018_s21  ;;  %366 = vrot.lane.b32.xlu0 %v1533_v5, %s2017_s28  ;;  %p1928_p0 = pnand %p1927_p8, %p2094_p9 }
  0x45   : > { %p1929_p2 = pneg %p1928_p0 }
  0x47   : > { %328 = vrot.lane.b32.xlu1 %v1544_v6, %s2018_s21  ;;  %310 = vrot.lane.b32.xlu0 %v1539_v7, %s2017_s28  ;;  %v237_v7 = vsub.s32 0, %v234_v61 }
  0x4b   : > { %374 = vrot.lane.b32.xlu0 %v1535_v11, %s2016_s19  ;;  %392 = vrot.lane.b32.xlu1 %v301_v10, %s2019_s29 }
  0x4f   : > { %318 = vrot.lane.b32.xlu0 %v1541_v13, %s2016_s19  ;;  %336 = vrot.lane.b32.xlu1 %v293_v12, %s2019_s29 }
  0x53   : > { %382 = vrot.lane.b32.xlu0 %v1537_v15, %s2018_s21  ;;  %400 = vrot.lane.b32.xlu1 %v303_v14, %s2020_s3  ;;  %v2255_v15 = vmin.u32 %v237_v7, %v234_v61 }
  0x55   : > { %vm242_vm7 = vcmp.le.s32.totalorder %v2255_v15, 2 }
  0x57   : > { %326 = vrot.lane.b32.xlu0 %v1543_v17, %s2018_s21  ;;  %344 = vrot.lane.b32.xlu1 %v295_v16, %s2020_s3 }
  0x5b   : > { %408 = vrot.lane.b32.xlu1 %v305_v20, %s2021_s7  ;;  %390 = vrot.lane.b32.xlu0 %v300_v21, %s2019_s29 }
  0x5f   : > { %352 = vrot.lane.b32.xlu1 %v297_v22, %s2021_s7  ;;  %334 = vrot.lane.b32.xlu0 %v292_v23, %s2019_s29 }
  0x63   : > { %416 = vrot.lane.b32.xlu1 %v307_v24, %s2022_s8  ;;  %398 = vrot.lane.b32.xlu0 %v302_v25, %s2020_s3 }
  0x67   : > { %360 = vrot.lane.b32.xlu1 %v299_v26, %s2022_s8  ;;  %342 = vrot.lane.b32.xlu0 %v294_v27, %s2020_s3 }
  0x6b   : > { %350 = vrot.lane.b32.xlu1 %v296_v30, %s2021_s7  ;;  %406 = vrot.lane.b32.xlu0 %v304_v29, %s2021_s7 }
  0x6f   : > { %358 = vrot.lane.b32.xlu1 %v298_v32, %s2022_s8  ;;  %414 = vrot.lane.b32.xlu0 %v306_v31, %s2022_s8 }
  0xad   : > { %v377_v33 = vpop.permute.xlu1 %376  ;;  %v369_v34 = vpop.permute.xlu0 %368 }
  0xae   : > { %v441_v52 = vsel %vm248_vm0, %v2193_v8, %v369_v34  ;;  %v235_v8 = vsub.s32 %v231_v62, %v233_v54 }
  0xaf   : > { %v443_v55 = vsel %vm422_vm1, %v441_v52, %v377_v33 }
  0xb0   : > { %v240_v16 = vsub.s32 0, %v235_v8 }
  0xb1   : > { %v321_v35 = vpop.permute.xlu1 %320  ;;  %v313_v36 = vpop.permute.xlu0 %312 }
  0xb2   : > { %v421_v58 = vsel %vm248_vm0, %v2196_v9, %v313_v36 }
  0xb3   : > { %v424_v0 = vsel %vm422_vm1, %v421_v58, %v321_v35 }
  0xb5   : > { %v385_v37 = vpop.permute.xlu1 %384  ;;  %v367_v38 = vpop.permute.xlu0 %366 }
  0xb6   : > { %v445_v59 = vsel %vm425_vm2, %v443_v55, %v385_v37  ;;  %v440_v17 = vsel %vm248_vm0, %v2215_v18, %v367_v38  ;;  %v2268_v18 = vmin.u32 %v240_v16, %v235_v8  ;;  %v2279_v38 = vsel %vm242_vm7, 1.0, %v2023_v28 }
  0xb8   : > { %vm243_vm8 = vcmp.le.s32.totalorder %v2268_v18, 2 }
  0xb9   : > { %v329_v39 = vpop.permute.xlu1 %328  ;;  %v311_v40 = vpop.permute.xlu0 %310 }
  0xba   : > { %v427_v4 = vsel %vm425_vm2, %v424_v0, %v329_v39  ;;  %v420_v20 = vsel %vm248_vm0, %v2218_v19, %v311_v40  ;;  %v2288_v39 = vsel %vm243_vm8, 1.0, %v2023_v28  ;;  %v2024_v40 = vmov 1.0  }
  0xbb   : > { %1758 = vmatprep.subr.msk.mxu1 %vm243_vm8, %v2024_v40 }
  0xbc   : > { %1760 = vmatpush3.msk.msra.mxu1 %vm243_vm8, %v2024_v40 }
  0xbd   : > { %v375_v41 = vpop.permute.xlu0 %374  ;;  %v393_v42 = vpop.permute.xlu1 %392  ;;  %1759 = vmatprep.subr.msk.mxu1 %vm242_vm7, %v2024_v40 }
  0xbe   : > { %v447_v60 = vsel %vm428_vm3, %v445_v59, %v393_v42  ;;  %v442_v21 = vsel %vm422_vm1, %v440_v17, %v375_v41  ;;  %1761 = vmatpush3.msk.msra.mxu1 %vm242_vm7, %v2024_v40 }
  0xc1   : > { %v319_v43 = vpop.permute.xlu0 %318  ;;  %v337_v44 = vpop.permute.xlu1 %336 }
  0xc2   : > { %v430_v6 = vsel %vm428_vm3, %v427_v4, %v337_v44  ;;  %v423_v22 = vsel %vm422_vm1, %v420_v20, %v319_v43  ;;  %v2348_v44 = vsel %vm248_vm0, %v2288_v39, 0.0 }
  0xc5   : > { %v383_v45 = vpop.permute.xlu0 %382  ;;  %v401_v46 = vpop.permute.xlu1 %400 }
  0xc6   : > { %v449_v63 = vsel %vm431_vm4, %v447_v60, %v401_v46  ;;  %v444_v25 = vsel %vm425_vm2, %v442_v21, %v383_v45  ;;  %v249_v45 = vsel %vm248_vm0, %v2279_v38, 0.0 }
  0xc9   : > { %v327_v47 = vpop.permute.xlu0 %326  ;;  %v345_v48 = vpop.permute.xlu1 %344 }
  0xca   : > { %v433_v10 = vsel %vm431_vm4, %v430_v6, %v345_v48  ;;  %v426_v26 = vsel %vm425_vm2, %v423_v22, %v327_v47 }
  0xcd   : > { %v409_v50 = vpop.permute.xlu1 %408  ;;  %v391_v51 = vpop.permute.xlu0 %390 }
  0xce   : > { %v451_v1 = vsel %vm434_vm5, %v449_v63, %v409_v50  ;;  %v446_v27 = vsel %vm428_vm3, %v444_v25, %v391_v51 }
  0xd1   : > { %v353_v56 = vpop.permute.xlu1 %352  ;;  %v335_v57 = vpop.permute.xlu0 %334 }
  0xd2   : > { %v436_v11 = vsel %vm434_vm5, %v433_v10, %v353_v56  ;;  %v429_v29 = vsel %vm428_vm3, %v426_v26, %v335_v57 }
  0xd5   : > { %v417_v2 = vpop.permute.xlu1 %416  ;;  %v399_v3 = vpop.permute.xlu0 %398 }
  0xd6   : > { %v453_v5 = vsel %vm437_vm6, %v451_v1, %v417_v2  ;;  %v448_v30 = vsel %vm431_vm4, %v446_v27, %v399_v3 }
  0xd7   : > { %488 = vmatprep.subr.mxu0 %v453_v5 }
  0xd9   : > { %v361_v12 = vpop.permute.xlu1 %360  ;;  %v343_v13 = vpop.permute.xlu0 %342 }
  0xda   : > { %v439_v14 = vsel %vm437_vm6, %v436_v11, %v361_v12  ;;  %v432_v31 = vsel %vm431_vm4, %v429_v29, %v343_v13  ;;  %v255_v11 = vadd.f32 %v2348_v44, %v249_v45 }
  0xdb   : > { %489 = vmatpush1.msra.mxu0 %v439_v14 }
  0xdc   : > { %v256_v12 = vrot.slane %v255_v11, 4 }
  0xdd   : > { %v351_v23 = vpop.permute.xlu1 %350  ;;  %v407_v24 = vpop.permute.xlu0 %406 }
  0xde   : > { %v435_v32 = vsel %vm434_vm5, %v432_v31, %v351_v23  ;;  %v450_v33 = vsel %vm434_vm5, %v448_v30, %v407_v24  ;;  %v257_v13 = vadd.f32 %v256_v12, %v255_v11 }
  0xe0   : > { %v258_v14 = vrot.slane %v257_v13, 2 }
  0xe1   : > { %v359_v34 = vpop.permute.xlu1 %358  ;;  %v415_v35 = vpop.permute.xlu0 %414 }
  0xe2   : > { %v452_v36 = vsel %vm437_vm6, %v450_v33, %v415_v35  ;;  %v438_v37 = vsel %vm437_vm6, %v435_v32, %v359_v34  ;;  %v259_v16 = vadd.f32 %v258_v14, %v257_v13 }
  0xe3   : > { %490 = vmatprep.subr.mxu0 %v452_v36 }
  0xe4   : > { %491 = vmatpush1.msra.mxu0 %v438_v37  ;;  %v260_v17 = vrot.slane %v259_v16, 1 }
  0xe5   : > { %1545 = vmatmul.mubr.msk.f32.vlgmr.msra.gmra.mxu0 %vm248_vm0, %v2279_v38  ;;  %1671 = vmatprep.subr.msk.mxu0 %vm243_vm8, %v2024_v40 }
  0xe6   : > { %530 = vmatprep.mubr.f32.mxu0 %v2023_v28  ;;  %1672 = vmatpush3.msk.msra.mxu0 %vm243_vm8, %v2024_v40  ;;  %v261_v20 = vadd.f32 %v260_v17, %v259_v16 }
  0xe7   : > { %1673 = vmatprep.subr.msk.mxu0 %vm242_vm7, %v2024_v40 }
  0xe8   : > { %1674 = vmatpush3.msk.msra.mxu0 %vm242_vm7, %v2024_v40  ;;  %1842 = vrcp.f32 %v261_v20 }
  0xe9   : > { %1546 = vmatmul.mubr.msk.f32.gmra.mxu0 %vm248_vm0, %v2288_v39 }
  0xf5   : > { %v1843_v29 = vpop.eup %1842 }
 0x1a5   : > { %v526_v28 = vpop.f32.mrf.mxu0 }
 0x1a6   : > { %543 = vrot.lane.b32.xlu0 %v526_v28, %s2021_s7  ;;  %1675 = vmatprep.mubr.msk.f32.mxu0 %vm248_vm0, %v526_v28 }
 0x1a7   : > { %v528_v41 = vpop.f32.mrf.mxu0 }
 0x1a9   : > { %v532_v42 = vpop.f32.mrf.mxu0 }
 0x1aa   : > { %547 = vrot.lane.b32.xlu0 %v526_v28, %s2020_s3  ;;  %545 = vrot.lane.b32.xlu1 %v532_v42, %s2021_s7 }
 0x1ab   : > { %1676 = vmatmul.mubr.msk.f32.vlgmr.msra.gmra.mxu0 %vm248_vm0, %v532_v42  ;;  %v534_v43 = vpop.f32.mrf.mxu0 }
 0x1ae   : > { %551 = vrot.lane.b32.xlu0 %v526_v28, %s2019_s29  ;;  %549 = vrot.lane.b32.xlu1 %v532_v42, %s2020_s3 }
 0x1b2   : > { %555 = vrot.lane.b32.xlu0 %v526_v28, %s2018_s21  ;;  %553 = vrot.lane.b32.xlu1 %v532_v42, %s2019_s29 }
 0x1b6   : > { %559 = vrot.lane.b32.xlu0 %v526_v28, %s2016_s19  ;;  %557 = vrot.lane.b32.xlu1 %v532_v42, %s2018_s21 }
 0x1ba   : > { %563 = vrot.lane.b32.xlu0 %v526_v28, %s2017_s28  ;;  %561 = vrot.lane.b32.xlu1 %v532_v42, %s2016_s19 }
 0x1be   : > { %539 = vrot.lane.b32.xlu0 %v526_v28, %s2022_s8  ;;  %565 = vrot.lane.b32.xlu1 %v532_v42, %s2017_s28 }
 0x1c2   : > { %569 = vrot.lane.b32.xlu0 %v528_v41, %s2022_s8  ;;  %573 = vrot.lane.b32.xlu1 %v528_v41, %s2021_s7 }
 0x1c6   : > { %541 = vrot.lane.b32.xlu0 %v532_v42, %s2022_s8  ;;  %571 = vrot.lane.b32.xlu1 %v534_v43, %s2022_s8 }
 0x1ca   : > { %577 = vrot.lane.b32.xlu0 %v528_v41, %s2020_s3  ;;  %575 = vrot.lane.b32.xlu1 %v534_v43, %s2021_s7 }
 0x1ce   : > { %581 = vrot.lane.b32.xlu0 %v528_v41, %s2019_s29  ;;  %579 = vrot.lane.b32.xlu1 %v534_v43, %s2020_s3 }
 0x1d2   : > { %585 = vrot.lane.b32.xlu0 %v528_v41, %s2018_s21  ;;  %583 = vrot.lane.b32.xlu1 %v534_v43, %s2019_s29 }
 0x1d6   : > { %589 = vrot.lane.b32.xlu0 %v528_v41, %s2016_s19  ;;  %587 = vrot.lane.b32.xlu1 %v534_v43, %s2018_s21 }
 0x1da   : > { %593 = vrot.lane.b32.xlu0 %v528_v41, %s2017_s28  ;;  %591 = vrot.lane.b32.xlu1 %v534_v43, %s2016_s19 }
 0x1de   : > { %595 = vrot.lane.b32.xlu1 %v534_v43, %s2017_s28 }
 0x1f9   : > { %253 = vadd.xlane.f32.xlu0 %v2348_v44 }
 0x202   : > { %250 = vadd.xlane.f32.xlu1 %v249_v45 }
 0x218   : > { %v544_v46 = vpop.permute.xlu0 %543 }
 0x219   : > { %1681 = vmatprep.mubr.msk.f32.mxu1 %vm248_vm0, %v544_v46 }
 0x21c   : > { %v548_v47 = vpop.permute.xlu0 %547  ;;  %v546_v48 = vpop.permute.xlu1 %545 }
 0x21d   : > { %1682 = vmatmul.mubr.msk.f32.vlgmr.msra.gmra.mxu1 %vm248_vm0, %v546_v48 }
 0x21e   : > { %1684 = vmatprep.mubr.msk.f32.mxu1 %vm248_vm0, %v548_v47 }
 0x220   : > { %v552_v49 = vpop.permute.xlu0 %551  ;;  %v550_v50 = vpop.permute.xlu1 %549 }
 0x221   : > { %1685 = vmatmul.mubr.msk.f32.gmra.mxu1 %vm248_vm0, %v550_v50 }
 0x222   : > { %1687 = vmatprep.mubr.msk.f32.mxu1 %vm248_vm0, %v552_v49 }
 0x224   : > { %v556_v51 = vpop.permute.xlu0 %555  ;;  %v554_v52 = vpop.permute.xlu1 %553 }
 0x225   : > { %1688 = vmatmul.mubr.msk.f32.gmra.mxu1 %vm248_vm0, %v554_v52 }
 0x226   : > { %1690 = vmatprep.mubr.msk.f32.mxu1 %vm248_vm0, %v556_v51 }
 0x228   : > { %v560_v53 = vpop.permute.xlu0 %559  ;;  %v558_v54 = vpop.permute.xlu1 %557 }
 0x229   : > { %1691 = vmatmul.mubr.msk.f32.gmra.mxu1 %vm248_vm0, %v558_v54 }
 0x22a   : > { %1693 = vmatprep.mubr.msk.f32.mxu1 %vm248_vm0, %v560_v53 }
 0x22c   : > { %v564_v55 = vpop.permute.xlu0 %563  ;;  %v562_v56 = vpop.permute.xlu1 %561 }
 0x22d   : > { %1694 = vmatmul.mubr.msk.f32.gmra.mxu1 %vm248_vm0, %v562_v56 }
 0x22e   : > { %1696 = vmatprep.mubr.msk.f32.mxu1 %vm248_vm0, %v564_v55 }
 0x230   : > { %v540_v57 = vpop.permute.xlu0 %539  ;;  %v566_v58 = vpop.permute.xlu1 %565 }
 0x231   : > { %1678 = vmatprep.mubr.msk.f32.mxu0 %vm248_vm0, %v540_v57  ;;  %1697 = vmatmul.mubr.msk.f32.gmra.mxu1 %vm248_vm0, %v566_v58 }
 0x232   : > { %1699 = vmatprep.mubr.msk.f32.mxu1 %vm248_vm0, %v528_v41 }
 0x234   : > { %v570_v59 = vpop.permute.xlu0 %569  ;;  %v574_v60 = vpop.permute.xlu1 %573 }
 0x235   : > { %1700 = vmatmul.mubr.msk.f32.gmra.mxu1 %vm248_vm0, %v534_v43 }
 0x236   : > { %1702 = vmatprep.mubr.msk.f32.mxu1 %vm248_vm0, %v570_v59 }
 0x238   : > { %v542_v61 = vpop.permute.xlu0 %541  ;;  %v572_v62 = vpop.permute.xlu1 %571 }
 0x239   : > { %1679 = vmatmul.mubr.msk.f32.gmra.mxu0 %vm248_vm0, %v542_v61  ;;  %1703 = vmatmul.mubr.msk.f32.gmra.mxu1 %vm248_vm0, %v572_v62 }
 0x23a   : > { %1705 = vmatprep.mubr.msk.f32.mxu1 %vm248_vm0, %v574_v60  ;;  %1727 = vmatprep.mubr.msk.f32.mxu0 %vm248_vm0, %v2279_v38 }
 0x23c   : > { %v578_v63 = vpop.permute.xlu0 %577  ;;  %v576_v0 = vpop.permute.xlu1 %575 }
 0x23d   : > { %1706 = vmatmul.mubr.msk.f32.gmra.mxu1 %vm248_vm0, %v576_v0 }
 0x23e   : > { %1708 = vmatprep.mubr.msk.f32.mxu1 %vm248_vm0, %v578_v63 }
 0x240   : > { %v582_v1 = vpop.permute.xlu0 %581  ;;  %v580_v2 = vpop.permute.xlu1 %579 }
 0x241   : > { %1709 = vmatmul.mubr.msk.f32.gmra.mxu1 %vm248_vm0, %v580_v2 }
 0x242   : > { %1711 = vmatprep.mubr.msk.f32.mxu1 %vm248_vm0, %v582_v1 }
 0x244   : > { %v586_v3 = vpop.permute.xlu0 %585  ;;  %v584_v4 = vpop.permute.xlu1 %583 }
 0x245   : > { %1712 = vmatmul.mubr.msk.f32.gmra.mxu1 %vm248_vm0, %v584_v4 }
 0x246   : > { %1714 = vmatprep.mubr.msk.f32.mxu1 %vm248_vm0, %v586_v3 }
 0x248   : > { %v590_v5 = vpop.permute.xlu0 %589  ;;  %v588_v6 = vpop.permute.xlu1 %587 }
 0x249   : > { %1715 = vmatmul.mubr.msk.f32.gmra.mxu1 %vm248_vm0, %v588_v6 }
 0x24a   : > { %1717 = vmatprep.mubr.msk.f32.mxu1 %vm248_vm0, %v590_v5 }
 0x24c   : > { %v594_v7 = vpop.permute.xlu0 %593  ;;  %v592_v8 = vpop.permute.xlu1 %591 }
 0x24d   : > { %1718 = vmatmul.mubr.msk.f32.gmra.mxu1 %vm248_vm0, %v592_v8 }
 0x24e   : > { %1720 = vmatprep.mubr.msk.f32.mxu1 %vm248_vm0, %v594_v7 }
 0x250   : > { %v596_v10 = vpop.permute.xlu1 %595 }
 0x251   : > { %1721 = vmatmul.mubr.msk.f32.gmra.mxu1 %vm248_vm0, %v596_v10 }
 0x26b   : > { %v1677_v36 = vpop.f32.mrf.mxu0 }
 0x26d   : > { %v727_v44 = vpop.f32.mrf.mxu0 }
 0x282   : > { %v254_v21 = vpop.xlane.xlu0 %253 }
 0x283   : > { %1844 = vrcp.f32 %v254_v21 }
 0x28b   : > { %v251_v22 = vpop.xlane.xlu1 %250 }
 0x28c   : > { %1846 = vrcp.f32 %v251_v22 }
 0x290   : > { %v1845_v30 = vpop.eup %1844 }
 0x291   : > { %v2386_v33 = vmul.f32 %v1845_v30, %v1843_v29 }
 0x293   : > { %v2389_v38 = vmul.f32 %v1677_v36, %v2386_v33 }
 0x295   : > { %v899_v45 = vmul.f32 %v2389_v38, %v2389_v38 }
 0x299   : > { %v1847_v35 = vpop.eup %1846 }
 0x29a   : > { %v2391_v28 = vmul.f32 %v1847_v35, %v1843_v29 }
 0x29c   : > { %v2397_v46 = vmul.f32 %v727_v44, %v2391_v28 }
 0x29e   : > { %v898_v52 = vmul.f32 %v2397_v46, %v2397_v46 }
 0x2dd   : > { %v1683_v23 = vpop.f32.mrf.mxu1 }
 0x2de   : > { %v2400_v49 = vmul.f32 %v1683_v23, %v2386_v33 }
 0x2df   : > { %v747_v24 = vpop.f32.mrf.mxu1 }
 0x2e0   : > { %v951_v57 = vmul.f32 %v2400_v49, %v2400_v49  ;;  %v2424_v10 = vmul.f32 %v747_v24, %v2391_v28 }
 0x2e1   : > { %v1686_v25 = vpop.f32.mrf.mxu1 }
 0x2e2   : > { %v2418_v3 = vmul.f32 %v1686_v25, %v2386_v33  ;;  %v950_v25 = vmul.f32 %v2424_v10, %v2424_v10 }
 0x2e3   : > { %v757_v26 = vpop.f32.mrf.mxu1 }
 0x2e4   : > { %v2430_v17 = vmul.f32 %v757_v26, %v2391_v28  ;;  %v977_v21 = vmul.f32 %v2418_v3, %v2418_v3 }
 0x2e5   : > { %v1689_v27 = vpop.f32.mrf.mxu1 }
 0x2e6   : > { %v897_v42 = vmul.f32 %v1689_v27, %v2386_v33 }
 0x2e7   : > { %v767_v31 = vpop.f32.mrf.mxu1 }
 0x2e8   : > { %v901_v48 = vsub.f32 %v897_v42, %v899_v45  ;;  %v896_v50 = vmul.f32 %v767_v31, %v2391_v28  ;;  %v976_v31 = vmul.f32 %v2430_v17, %v2430_v17 }
 0x2e9   : > { %v1692_v32 = vpop.f32.mrf.mxu1 }
 0x2ea   : > { %v903_v55 = vadd.f32 1e-08, %v901_v48  ;;  %v900_v56 = vsub.f32 %v896_v50, %v898_v52  ;;  %v923_v0 = vmul.f32 %v1692_v32, %v2386_v33 }
 0x2eb   : > { %v777_v34 = vpop.f32.mrf.mxu1 }
 0x2ec   : > { %1848 = vrcp.f32 %v903_v55  ;;  %v902_v4 = vadd.f32 1e-08, %v900_v56  ;;  %v922_v6 = vmul.f32 %v777_v34, %v2391_v28 }
 0x2ed   : > { %v1695_v37 = vpop.f32.mrf.mxu1 }
 0x2ee   : > { %v949_v53 = vmul.f32 %v1695_v37, %v2386_v33  ;;  %1850 = vrcp.f32 %v902_v4 }
 0x2ef   : > { %v787_v41 = vpop.f32.mrf.mxu1 }
 0x2f0   : > { %v953_v61 = vsub.f32 %v949_v53, %v951_v57  ;;  %v948_v20 = vmul.f32 %v787_v41, %v2391_v28 }
 0x2f1   : > { %v1698_v43 = vpop.f32.mrf.mxu1 }
 0x2f2   : > { %v955_v11 = vadd.f32 1e-08, %v953_v61  ;;  %v975_v12 = vmul.f32 %v1698_v43, %v2386_v33  ;;  %v952_v30 = vsub.f32 %v948_v20, %v950_v25 }
 0x2f3   : > { %v797_v47 = vpop.f32.mrf.mxu1 }
 0x2f4   : > { %v979_v27 = vsub.f32 %v975_v12, %v977_v21  ;;  %v974_v29 = vmul.f32 %v797_v47, %v2391_v28  ;;  %v954_v48 = vadd.f32 1e-08, %v952_v30 }
 0x2f5   : > { %v1701_v51 = vpop.f32.mrf.mxu1 }
 0x2f6   : > { %v889_v23 = vmul.f32 %v1701_v51, %v2386_v33  ;;  %v981_v37 = vadd.f32 1e-08, %v979_v27  ;;  %v978_v41 = vsub.f32 %v974_v29, %v976_v31 }
 0x2f7   : > { %v807_v54 = vpop.f32.mrf.mxu1 }
 0x2f8   : > { %v893_v34 = vmul.f32 %v889_v23, %v2389_v38  ;;  %v2443_v35 = vmul.f32 %v807_v54, %v2391_v28  ;;  %v980_v55 = vadd.f32 1e-08, %v978_v41 }
 0x2f9   : > { %v1680_v58 = vpop.f32.mrf.mxu0  ;;  %v1704_v59 = vpop.f32.mrf.mxu1 }
 0x2fa   : > { %v2409_v60 = vmul.f32 %v1680_v58, %v2386_v33  ;;  %v915_v43 = vmul.f32 %v1704_v59, %v2386_v33  ;;  %v1849_v47 = vpop.eup %1848  ;;  %v892_v52 = vmul.f32 %v2443_v35, %v2397_v46 }
 0x2fb   : > { %v737_v62 = vpop.f32.mrf.mxu0  ;;  %v817_v63 = vpop.f32.mrf.mxu1 }
 0x2fc   : > { %v925_v1 = vmul.f32 %v2409_v60, %v2409_v60  ;;  %v2415_v2 = vmul.f32 %v737_v62, %v2391_v28  ;;  %v919_v57 = vmul.f32 %v915_v43, %v2409_v60  ;;  %v914_v58 = vmul.f32 %v817_v63, %v2391_v28 }
 0x2fd   : > { %v1707_v5 = vpop.f32.mrf.mxu1 }
 0x2fe   : > { %v927_v7 = vsub.f32 %v923_v0, %v925_v1  ;;  %v924_v8 = vmul.f32 %v2415_v2, %v2415_v2  ;;  %v2449_v50 = vmul.f32 %v1707_v5, %v2386_v33  ;;  %v1851_v1 = vpop.eup %1850 }
 0x2ff   : > { %v2427_v13 = vpop.f32.mrf.mxu1 }
 0x300   : > { %v929_v14 = vadd.f32 1e-08, %v927_v7  ;;  %v926_v16 = vsub.f32 %v922_v6, %v924_v8  ;;  %v945_v62 = vmul.f32 %v2449_v50, %v2400_v49  ;;  %v940_v25 = vmul.f32 %v2427_v13, %v2391_v28 }
 0x301   : > { %v1710_v22 = vpop.f32.mrf.mxu1 }
 0x302   : > { %1852 = vrcp.f32 %v929_v14  ;;  %v928_v24 = vadd.f32 1e-08, %v926_v16  ;;  %v967_v63 = vmul.f32 %v1710_v22, %v2386_v33 }
 0x303   : > { %1854 = vrcp.f32 %v955_v11  ;;  %v837_v26 = vpop.f32.mrf.mxu1 }
 0x304   : > { %1856 = vrcp.f32 %v928_v24  ;;  %v971_v29 = vmul.f32 %v967_v63, %v2418_v3 }
 0x305   : > { %v1713_v32 = vpop.f32.mrf.mxu1  ;;  %1858 = vrcp.f32 %v981_v37  ;;  %v944_v37 = vmul.f32 %v940_v25, %v2424_v10 }
 0x306   : > { %v891_v36 = vmul.f32 %v1713_v32, %v2386_v33  ;;  %1860 = vrcp.f32 %v954_v48  ;;  %v966_v32 = vmul.f32 %v837_v26, %v2391_v28 }
 0x307   : > { %v847_v42 = vpop.f32.mrf.mxu1  ;;  %1862 = vrcp.f32 %v980_v55 }
 0x308   : > { %v895_v44 = vsub.f32 %v891_v36, %v893_v34  ;;  %v890_v45 = vmul.f32 %v847_v42, %v2391_v28 }
 0x309   : > { %v1716_v51 = vpop.f32.mrf.mxu1 }
 0x30a   : > { %v2453_v53 = vmul.f32 %v1849_v47, %v895_v44  ;;  %v917_v54 = vmul.f32 %v1716_v51, %v2386_v33  ;;  %v894_v59 = vsub.f32 %v890_v45, %v892_v52 }
 0x30b   : > { %v857_v56 = vpop.f32.mrf.mxu1 }
 0x30c   : > { %v909_v61 = vmul.f32 %v2453_v53, %v2389_v38  ;;  %v921_v4 = vsub.f32 %v917_v54, %v919_v57  ;;  %v916_v5 = vmul.f32 %v857_v56, %v2391_v28  ;;  %v918_v38 = vmul.f32 %v914_v58, %v2415_v2 }
 0x30d   : > { %v1719_v0 = vpop.f32.mrf.mxu1  ;;  %v2466_v14 = vmul.f32 %v1851_v1, %v894_v59 }
 0x30e   : > { %v943_v6 = vmul.f32 %v1719_v0, %v2386_v33  ;;  %v911_v7 = vsub.f32 %v889_v23, %v909_v61  ;;  %v920_v23 = vsub.f32 %v916_v5, %v918_v38 }
 0x30f   : > { %v1853_v8 = vpop.eup %1852  ;;  %v867_v11 = vpop.f32.mrf.mxu1  ;;  %v908_v13 = vmul.f32 %v2466_v14, %v2397_v46 }
 0x310   : > { %v1855_v12 = vpop.eup %1854  ;;  %v947_v16 = vsub.f32 %v943_v6, %v945_v62  ;;  %1018 = vrot.lane.b32.xlu1 %v911_v7, %s2019_s29  ;;  %v933_v20 = vmul.f32 %v1853_v8, %v921_v4  ;;  %v942_v34 = vmul.f32 %v867_v11, %v2391_v28 }
 0x311   : > { %v1857_v21 = vpop.eup %1856  ;;  %v1722_v24 = vpop.f32.mrf.mxu1  ;;  %v910_v47 = vsub.f32 %v2443_v35, %v908_v13 }
 0x312   : > { %v969_v27 = vmul.f32 %v1722_v24, %v2386_v33  ;;  %994 = vrot.lane.b32.xlu0 %v933_v20, %s2017_s28  ;;  %v959_v22 = vmul.f32 %v1855_v12, %v947_v16  ;;  %v935_v31 = vmul.f32 %v933_v20, %v2409_v60  ;;  %v931_v36 = vmul.f32 %v1857_v21, %v920_v23  ;;  %v1859_v45 = vpop.eup %1858 }
 0x313   : > { %v877_v30 = vpop.f32.mrf.mxu1  ;;  %v970_v60 = vmul.f32 %v966_v32, %v2430_v17  ;;  %v946_v26 = vsub.f32 %v942_v34, %v944_v37  ;;  %v1861_v48 = vpop.eup %1860 }
 0x314   : > { %1002 = vrot.lane.b32.xlu1 %v959_v22, %s2016_s19  ;;  %v973_v41 = vsub.f32 %v969_v27, %v971_v29  ;;  %v968_v42 = vmul.f32 %v877_v30, %v2391_v28  ;;  %v937_v44 = vsub.f32 %v915_v43, %v935_v31  ;;  %v961_v52 = vmul.f32 %v959_v22, %v2400_v49  ;;  %v1863_v54 = vpop.eup %1862 }
 0x315   : > { %v957_v55 = vmul.f32 %v1861_v48, %v946_v26  ;;  %v934_v43 = vmul.f32 %v931_v36, %v2415_v2 }
 0x316   : > { %992 = vrot.lane.b32.xlu0 %v931_v36, %s2017_s28  ;;  %v972_v51 = vsub.f32 %v968_v42, %v970_v60  ;;  %v985_v46 = vmul.f32 %v1859_v45, %v973_v41  ;;  %v963_v56 = vsub.f32 %v2449_v50, %v961_v52 }
 0x317   : > { %v936_v59 = vsub.f32 %v914_v58, %v934_v43  ;;  %v960_v62 = vmul.f32 %v957_v55, %v2424_v10 }
 0x318   : > { %1026 = vrot.lane.b32.xlu1 %v937_v44, %s2020_s3  ;;  %v987_v57 = vmul.f32 %v985_v46, %v2418_v3  ;;  %v983_v35 = vmul.f32 %v1863_v54, %v972_v51 }
 0x319   : > { %v962_v50 = vsub.f32 %v940_v25, %v960_v62 }
 0x31a   : > { %1016 = vrot.lane.b32.xlu0 %v910_v47, %s2019_s29  ;;  %v989_v61 = vsub.f32 %v967_v63, %v987_v57  ;;  %v986_v49 = vmul.f32 %v983_v35, %v2430_v17 }
 0x31c   : > { %1010 = vrot.lane.b32.xlu1 %v985_v46, %s2018_s21  ;;  %v988_v2 = vsub.f32 %v966_v32, %v986_v49 }
 0x31e   : > { %1000 = vrot.lane.b32.xlu0 %v957_v55, %s2016_s19 }
 0x320   : > { %1034 = vrot.lane.b32.xlu1 %v963_v56, %s2021_s7 }
 0x322   : > { %1024 = vrot.lane.b32.xlu0 %v936_v59, %s2020_s3 }
 0x324   : > { %1042 = vrot.lane.b32.xlu1 %v989_v61, %s2022_s8 }
 0x326   : > { %1008 = vrot.lane.b32.xlu0 %v983_v35, %s2018_s21 }
 0x328   : > { %1040 = vrot.lane.b32.xlu1 %v988_v2, %s2022_s8 }
 0x32a   : > { %1032 = vrot.lane.b32.xlu0 %v962_v50, %s2021_s7 }
 0x382   : > { %v1019_v3 = vpop.permute.xlu1 %1018 }
 0x384   : > { %v995_v0 = vpop.permute.xlu0 %994 }
 0x385   : > { %v1047_v17 = vsel %vm248_vm0, %v2453_v53, %v995_v0 }
 0x386   : > { %v1003_v58 = vpop.permute.xlu1 %1002 }
 0x387   : > { %v1049_v6 = vsel %vm422_vm1, %v1047_v17, %v1003_v58 }
 0x388   : > { %v993_v1 = vpop.permute.xlu0 %992 }
 0x389   : > { %v1046_v21 = vsel %vm248_vm0, %v2466_v14, %v993_v1 }
 0x38a   : > { %v1027_v4 = vpop.permute.xlu1 %1026 }
 0x38c   : > { %v1017_v5 = vpop.permute.xlu0 %1016 }
 0x38e   : > { %v1011_v10 = vpop.permute.xlu1 %1010 }
 0x38f   : > { %v1051_v7 = vsel %vm425_vm2, %v1049_v6, %v1011_v10  ;;  %v1865_v10 = vld [vmem:[%s2164_s20 + $0x10] sm:$0xff] }
 0x390   : > { %v1053_v8 = vsel %vm428_vm3, %v1051_v7, %v1019_v3  ;;  %v1001_v63 = vpop.permute.xlu0 %1000 }
 0x391   : > { %v1055_v12 = vsel %vm431_vm4, %v1053_v8, %v1027_v4  ;;  %v1048_v24 = vsel %vm422_vm1, %v1046_v21, %v1001_v63  ;;  %v1864_v4 = vld [vmem:[%s2164_s20 + $0x18] sm:$0xff] }
 0x392   : > { %v1035_v11 = vpop.permute.xlu1 %1034 }
 0x393   : > { %v1057_v16 = vsel %vm434_vm5, %v1055_v12, %v1035_v11 }
 0x394   : > { %v1025_v38 = vpop.permute.xlu0 %1024 }
 0x396   : > { %v1043_v20 = vpop.permute.xlu1 %1042 }
 0x397   : > { %v1059_v53 = vsel %vm437_vm6, %v1057_v16, %v1043_v20 }
 0x398   : > { %1723 = vmatprep.subr.mxu0 %v1059_v53  ;;  %v1009_v25 = vpop.permute.xlu0 %1008 }
 0x399   : > { %v1050_v23 = vsel %vm425_vm2, %v1048_v24, %v1009_v25  ;;  %1724 = vmatpush3.msra.mxu0 %v1059_v53  ;;  %v1867_v25 = vld [vmem:[%s2164_s20 + $0x20] sm:$0xff] }
 0x39a   : > { %v1052_v27 = vsel %vm428_vm3, %v1050_v23, %v1017_v5  ;;  %v1041_v30 = vpop.permute.xlu1 %1040 }
 0x39b   : > { %v1054_v22 = vsel %vm431_vm4, %v1052_v27, %v1025_v38  ;;  %v1866_v38 = vld [vmem:[%s2164_s20 + $0x28] sm:$0xff] }
 0x39c   : > { %v1033_v29 = vpop.permute.xlu0 %1032 }
 0x39d   : > { %v1056_v31 = vsel %vm434_vm5, %v1054_v22, %v1033_v29 }
 0x39e   : > { %v1058_v32 = vsel %vm437_vm6, %v1056_v31, %v1041_v30  ;;  %v1868_v31 = vld [vmem:[%s2164_s20 + $0x38] sm:$0xff] }
 0x39f   : > { %1725 = vmatprep.subr.mxu0 %v1058_v32 }
 0x3a0   : > { %1726 = vmatpush3.msra.mxu0 %v1058_v32 }
 0x3a1   : > { %1728 = vmatmul.mubr.msk.f32.vlgmr.msra.gmra.mxu0 %vm248_vm0, %v2288_v39  ;;  %1730 = vmatprep.subr.msk.mxu0 %vm243_vm8, %v2024_v40 }
 0x3a2   : > { %1731 = vmatpush3.msk.msra.mxu0 %vm243_vm8, %v2024_v40 }
 0x3a3   : > { %1732 = vmatprep.subr.msk.mxu0 %vm242_vm7, %v2024_v40 }
 0x3a4   : > { %1733 = vmatpush3.msk.msra.mxu0 %vm242_vm7, %v2024_v40 }
 0x461   : > { %v1729_v14 = vpop.f32.mrf.mxu0 }
 0x462   : > { %1139 = vrot.lane.b32.xlu1 %v1729_v14, %s2022_s8 }
 0x463   : > { %v1126_v39 = vpop.f32.mrf.mxu0 }
 0x464   : > { %1137 = vrot.lane.b32.xlu0 %v1126_v39, %s2022_s8  ;;  %1734 = vmatprep.mubr.msk.f32.mxu0 %vm248_vm0, %v1126_v39 }
 0x465   : > { %1735 = vmatmul.mubr.msk.f32.vlgmr.msra.gmra.mxu0 %vm248_vm0, %v1729_v14 }
 0x466   : > { %1143 = vrot.lane.b32.xlu1 %v1729_v14, %s2021_s7 }
 0x468   : > { %1141 = vrot.lane.b32.xlu0 %v1126_v39, %s2021_s7 }
 0x46a   : > { %1147 = vrot.lane.b32.xlu1 %v1729_v14, %s2020_s3 }
 0x46c   : > { %1145 = vrot.lane.b32.xlu0 %v1126_v39, %s2020_s3 }
 0x46e   : > { %1151 = vrot.lane.b32.xlu1 %v1729_v14, %s2019_s29 }
 0x470   : > { %1149 = vrot.lane.b32.xlu0 %v1126_v39, %s2019_s29 }
 0x472   : > { %1155 = vrot.lane.b32.xlu1 %v1729_v14, %s2018_s21 }
 0x474   : > { %1153 = vrot.lane.b32.xlu0 %v1126_v39, %s2018_s21 }
 0x476   : > { %1159 = vrot.lane.b32.xlu1 %v1729_v14, %s2016_s19 }
 0x478   : > { %1157 = vrot.lane.b32.xlu0 %v1126_v39, %s2016_s19 }
 0x47a   : > { %1163 = vrot.lane.b32.xlu1 %v1729_v14, %s2017_s28 }
 0x47c   : > { %1161 = vrot.lane.b32.xlu0 %v1126_v39, %s2017_s28 }
 0x4d4   : > { %v1140_v15 = vpop.permute.xlu1 %1139 }
 0x4d6   : > { %v1138_v18 = vpop.permute.xlu0 %1137 }
 0x4d7   : > { %1737 = vmatprep.mubr.msk.f32.mxu0 %vm248_vm0, %v1138_v18  ;;  %v1869_v18 = vld [vmem:[%s2164_s20 + $0x30] sm:$0xff]  ;;  %s2025_s20 = smov [#allocation7]  }
 0x4d8   : > { %v1144_v40 = vpop.permute.xlu1 %1143  ;;  %1738 = vmatmul.mubr.msk.f32.gmra.mxu0 %vm248_vm0, %v1140_v15  ;;  %s1930_s5 = sshll.u32 %s2025_s20, 4  ;;  %s1931_s5 = int_to_ptr.vmem [resolvable:$false] %s1930_s5 }
 0x4d9   : > { %s1932_s18 = scalar_lea.vmem %s1931_s5, 2048  ;;  %p1933_p5 = scmp.lt.s32.totalorder %s2607_s30, %s1931_s5 }
 0x4da   : > { %v1142_v34 = vpop.permute.xlu0 %1141  ;;  %p1934_p6 = scmp.lt.s32.totalorder %s1932_s18, %s1926_s6 }
 0x4db   : > { %1740 = vmatprep.mubr.msk.f32.mxu0 %vm248_vm0, %v1142_v34 }
 0x4dc   : > { %v1148_v36 = vpop.permute.xlu1 %1147  ;;  %1741 = vmatmul.mubr.msk.f32.gmra.mxu0 %vm248_vm0, %v1144_v40  ;;  %p1935_p4 = por %p1934_p6, %p1933_p5 }
 0x4de   : > { %v1146_v13 = vpop.permute.xlu0 %1145  ;;  %p1936_p7 = pnand %p1935_p4, %p1929_p2 }
 0x4df   : > { %1743 = vmatprep.mubr.msk.f32.mxu0 %vm248_vm0, %v1146_v13 }
 0x4e0   : > { %v1152_v37 = vpop.permute.xlu1 %1151  ;;  %1744 = vmatmul.mubr.msk.f32.gmra.mxu0 %vm248_vm0, %v1148_v36 }
 0x4e2   : > { %v1150_v41 = vpop.permute.xlu0 %1149 }
 0x4e3   : > { %1746 = vmatprep.mubr.msk.f32.mxu0 %vm248_vm0, %v1150_v41 }
 0x4e4   : > { %v1156_v42 = vpop.permute.xlu1 %1155  ;;  %1747 = vmatmul.mubr.msk.f32.gmra.mxu0 %vm248_vm0, %v1152_v37 }
 0x4e6   : > { %v1154_v44 = vpop.permute.xlu0 %1153 }
 0x4e7   : > { %1749 = vmatprep.mubr.msk.f32.mxu0 %vm248_vm0, %v1154_v44 }
 0x4e8   : > { %1750 = vmatmul.mubr.msk.f32.gmra.mxu0 %vm248_vm0, %v1156_v42  ;;  %v1160_v45 = vpop.permute.xlu1 %1159 }
 0x4ea   : > { %v1158_v60 = vpop.permute.xlu0 %1157 }
 0x4eb   : > { %1752 = vmatprep.mubr.msk.f32.mxu0 %vm248_vm0, %v1158_v60 }
 0x4ec   : > { %1753 = vmatmul.mubr.msk.f32.gmra.mxu0 %vm248_vm0, %v1160_v45  ;;  %v1164_v47 = vpop.permute.xlu1 %1163 }
 0x4ee   : > { %v1162_v26 = vpop.permute.xlu0 %1161 }
 0x4ef   : > { %1755 = vmatprep.mubr.msk.f32.mxu0 %vm248_vm0, %v1162_v26 }
 0x4f0   : > { %1756 = vmatmul.mubr.msk.f32.gmra.mxu0 %vm248_vm0, %v1164_v47 }
 0x525   : > { %v1736_v48 = vpop.f32.mrf.mxu0 }
 0x526   : > { %v1343_v56 = vmul.f32 %v1736_v48, %v2386_v33 }
 0x527   : > { %v1263_v51 = vpop.f32.mrf.mxu0 }
 0x528   : > { %v1342_v35 = vmul.f32 %v1263_v51, %v2391_v28  ;;  %v1347_v61 = vmul.f32 %v1343_v56, %v2196_v9 }
 0x52a   : > { %v1346_v50 = vmul.f32 %v1342_v35, %v2218_v19 }
 0x598   : > { %v1739_v46 = vpop.f32.mrf.mxu0 }
 0x599   : > { %v1353_v49 = vmul.f32 %v1739_v46, %v2386_v33 }
 0x59a   : > { %v1273_v52 = vpop.f32.mrf.mxu0 }
 0x59b   : > { %v1352_v3 = vmul.f32 %v1273_v52, %v2391_v28  ;;  %v1357_v17 = vmul.f32 %v1864_v4, %v1353_v49 }
 0x59c   : > { %v1742_v54 = vpop.f32.mrf.mxu0 }
 0x59d   : > { %v1364_v5 = vmul.f32 %v1742_v54, %v2386_v33  ;;  %v1356_v7 = vmul.f32 %v1865_v10, %v1352_v3 }
 0x59e   : > { %v1283_v55 = vpop.f32.mrf.mxu0 }
 0x59f   : > { %v1363_v8 = vmul.f32 %v1283_v55, %v2391_v28  ;;  %v1368_v16 = vmul.f32 %v1866_v38, %v1364_v5 }
 0x5a0   : > { %v1745_v43 = vpop.f32.mrf.mxu0 }
 0x5a1   : > { %v1375_v20 = vmul.f32 %v1745_v43, %v2386_v33  ;;  %v1367_v23 = vmul.f32 %v1867_v25, %v1363_v8 }
 0x5a2   : > { %v1293_v57 = vpop.f32.mrf.mxu0 }
 0x5a3   : > { %v1374_v27 = vmul.f32 %v1293_v57, %v2391_v28  ;;  %v1379_v32 = vmul.f32 %v1868_v31, %v1375_v20 }
 0x5a4   : > { %v1748_v59 = vpop.f32.mrf.mxu0 }
 0x5a5   : > { %v1345_v62 = vmul.f32 %v1748_v59, %v2386_v33  ;;  %v1378_v40 = vmul.f32 %v1869_v18, %v1374_v27 }
 0x5a6   : > { %v1303_v2 = vpop.f32.mrf.mxu0 }
 0x5a7   : > { %v1349_v0 = vadd.f32 %v1347_v61, %v1345_v62  ;;  %v1344_v58 = vmul.f32 %v1303_v2, %v2391_v28 }
 0x5a8   : > { %v1751_v1 = vpop.f32.mrf.mxu0 }
 0x5a9   : > { %1351 = vst.msk [vmem:[%s2572_s15 + $0x8] sm:$0xff] %vm248_vm0, %v1349_v0  ;;  %v1348_v9 = vadd.f32 %v1346_v50, %v1344_v58  ;;  %v1355_v19 = vmul.f32 %v1751_v1, %v2386_v33 }
 0x5aa   : > { %v1313_v6 = vpop.f32.mrf.mxu0 }
 0x5ab   : > { %1350 = vst.msk [vmem:[%s2572_s15] sm:$0xff] %vm248_vm0, %v1348_v9  ;;  %v1359_v63 = vadd.f32 %v1357_v17, %v1355_v19  ;;  %v1354_v11 = vmul.f32 %v1313_v6, %v2391_v28 }
 0x5ac   : > { %v1754_v12 = vpop.f32.mrf.mxu0 }
 0x5ad   : > { %1602 = vst.msk [vmem:[%s2572_s15 + $0x18] sm:$0xff] %vm248_vm0, %v1359_v63  ;;  %v1358_v21 = vadd.f32 %v1356_v7, %v1354_v11  ;;  %v1366_v53 = vmul.f32 %v1754_v12, %v2386_v33 }
 0x5ae   : > { %v1323_v24 = vpop.f32.mrf.mxu0 }
 0x5af   : > { %1601 = vst.msk [vmem:[%s2572_s15 + $0x10] sm:$0xff] %vm248_vm0, %v1358_v21  ;;  %v1370_v22 = vadd.f32 %v1368_v16, %v1366_v53  ;;  %v1365_v29 = vmul.f32 %v1323_v24, %v2391_v28 }
 0x5b0   : > { %v1757_v30 = vpop.f32.mrf.mxu0 }
 0x5b1   : > { %1604 = vst.msk [vmem:[%s2572_s15 + $0x28] sm:$0xff] %vm248_vm0, %v1370_v22  ;;  %v1369_v14 = vadd.f32 %v1367_v23, %v1365_v29  ;;  %v1377_v39 = vmul.f32 %v1757_v30, %v2386_v33 }
 0x5b2   : > { %v1333_v15 = vpop.f32.mrf.mxu0 }
 0x5b3   : > { %1603 = vst.msk [vmem:[%s2572_s15 + $0x20] sm:$0xff] %vm248_vm0, %v1369_v14  ;;  %v1381_v34 = vadd.f32 %v1379_v32, %v1377_v39  ;;  %v1376_v36 = vmul.f32 %v1333_v15, %v2391_v28 }
 0x5b5   : > { %1606 = vst.msk [vmem:[%s2572_s15 + $0x38] sm:$0xff] %vm248_vm0, %v1381_v34  ;;  %v1380_v33 = vadd.f32 %v1378_v40, %v1376_v36 }
 0x5b7   : > { %1605 = vst.msk [vmem:[%s2572_s15 + $0x30] sm:$0xff] %vm248_vm0, %v1380_v33 }
 0x5b8   : > { %1939 = shalt.err (!%p1936_p7)
}
 0x5b9   : > { %s1940_s19 = scalar_lea.hbm %s2605_s26, 1024  ;;  %s1944_s29 = scalar_lea.hbm %s2661_s2, 2048 }
 0x5ba   : > { %p1941_p10 = scmp.ne.s32.totalorder %s2605_s26, %s1940_s19  ;;  %p1945_p3 = scmp.lt.s32.totalorder %s2605_s26, %s2661_s2 }
 0x5bb   : > { %p1946_p8 = scmp.lt.s32.totalorder %s1944_s29, %s1940_s19 }
 0x5bc   : > { %p1942_p1 = pnand %p1941_p10, %p2094_p9 }
 0x5bd   : > { %p1947_p0 = por %p1946_p8, %p1945_p3 }
 0x5be   : > { %p1943_p13 = pneg %p1942_p1 }
 0x5c0   : > { %p1948_p2 = pnand %p1947_p0, %p1943_p13 }
 0x5c2   : > { %1951 = shalt.err (!%p1948_p2)
}
 0x5c3   : > { %s2026_s8 = smov 128   ;;  %s2027_s15 = smov 8  }
 0x5c4   : > { %1766 = dma.vmem_to_hbm [thread:$0]  (%p2094_p9), %s2607_s30, 1024, %s2605_s26, %s1386_s12, %s2026_s8, %s2026_s8, %s2027_s15  }
 0x5c5 PF: > { %s1417_s16 = sand.u32 1, %s1990_s9   ;;  %p1776_p5 = pnand %p1518_p12, %p2101_p11 }
 0x5c6   : > { %s1418_s4 = scalar_lea.sflag [#allocation4], %s1417_s16 }
 0x5c7   : > { %p1777_p6 = pneg %p1776_p5 }
 0x5c9   : > { %1985 = dma.done.wait (%p1777_p6), %s1418_s4, 1024  }
 0x5ca   : > { %1987 = vsyncadd (%p1777_p6), %s1418_s4, 4294966272  ;;  %s21_s14 = sadd.s32 1, %s2010_s14   ;;  %s2668_s9 = smov %s1994_s10 }
 0x5cb   : > { %p18_p4 = scmp.ge.s32.totalorder %s21_s14, 4   ;;  %s2669_s10 = smov %s1998_s11 }
 0x5cc   : > { %s2670_s11 = smov %s2099_s23  ;;  %s2671_s12 = smov %s2006_s13 }
 0x5cd   : > { %s2672_s13 = smov %s2674_s17  ;;  %20 = sbr.rel (!%p18_p4) target bundleno = 8 (0x8), region = 95 }
 0x5d2   :  { %1423 = vsyncpa [#allocation3], 1 }
 0x5d3   :  { %1425 = vsyncpa [#allocation3 + $0x1], 1 }
 0x5d4   :  { %1426 = vsyncpa [#allocation6], 1 }
 0x5d5   :  { %1428 = vsyncpa [#allocation6 + $0x1], 1 }
 0x5d6   :  { %1429 = vsyncpa [#allocation4], 1 }
 0x5d7   :  { %1431 = vsyncpa [#allocation4 + $0x1], 1 }

</bundles_post_ra>
